<compile_context>
chip_gen: v7x
topology: tpu7x:2x2x1
jax: 0.10.0
libtpu: 0.0.40
codegen_flags: <defaults>
</compile_context>

<pallas_src>
import functools

import jax
import jax.numpy as jnp
from jax.experimental import pallas as pl
from jax.experimental.pallas import tpu as pltpu

BN_EPS = 1e-5


def _round_up(v, m):
    return (v + m - 1) // m * m


def gin_conv_kernel(eps_ref, src_ref, dst_ref, x_ref, eemb_ref,
                    w1_ref, gamma_ref, beta_ref, w2_ref, b2_ref,
                    out_ref, xbf_ref, *, n_real):
    k = pl.program_id(0)
    tile_e = src_ref.shape[1]
    n_pad = x_ref.shape[0]

    @pl.when(k == 0)
    def _init():
        out_ref[...] = jnp.zeros_like(out_ref)           # accumulator lives in out_ref
        xbf_ref[...] = x_ref[...].astype(jnp.bfloat16)   # hoisted one-time cast

    # One-hot selection tiles built in-register from the [1, tile_e] int32
    # index rows: a cheap sublane broadcast + per-lane compare (no lane-dim
    # relayout).  Padded edge slots carry index -1 -> all-zero columns.
    node_iota = jax.lax.broadcasted_iota(jnp.int32, (n_pad, tile_e), 0)
    src_oh = (node_iota == src_ref[...]).astype(jnp.bfloat16)    # [N, tE]
    dst_oh = (node_iota == dst_ref[...]).astype(jnp.bfloat16)    # [N, tE]

    # gather: m_e = x[src[e]]  (transposed-LHS matmul, contract node axis)
    msg = jax.lax.dot_general(
        src_oh, xbf_ref[...],
        dimension_numbers=(((0,), (0,)), ((), ())),
        preferred_element_type=jnp.float32)                       # [tE, H]
    # message: relu(x[src[e]] + edge_emb[e])  (edge_emb streamed in bf16)
    msg = jnp.maximum(msg + eemb_ref[...].astype(jnp.float32), 0.0)

    # scatter-sum: new_x[v] += sum_{e: dst[e]==v} m_e  (MXU, f32 accumulate)
    out_ref[...] += jnp.dot(dst_oh, msg.astype(jnp.bfloat16),
                            preferred_element_type=jnp.float32)   # [N, H]

    # Last edge-tile: GIN update + MLP (Linear -> BN(train stats) -> ReLU -> Linear)
    @pl.when(k == pl.num_programs(0) - 1)
    def _finalize():
        acc = out_ref[...]                                        # aggregated new_x
        h = (1.0 + eps_ref[0]) * x_ref[...] + acc                 # [N, H] f32

        # Linear 1 (bf16 operands, f32 accumulation).  b1 omitted: a per-column
        # constant cancels exactly under training-mode BatchNorm mean
        # subtraction (and keeps padded rows of z exactly zero).
        z = jnp.dot(h.astype(jnp.bfloat16), w1_ref[...],
                    preferred_element_type=jnp.float32)           # [N, H]

        # BatchNorm1d with batch statistics over the n_real real rows.
        # Two-pass variance; padded rows are masked out of the centered sum.
        inv_n = 1.0 / n_real
        mean = jnp.sum(z, axis=0, keepdims=True) * inv_n          # [1, H]
        if n_real == n_pad:
            zc = z - mean
        else:
            rows = jax.lax.broadcasted_iota(jnp.int32, z.shape, 0)
            zc = jnp.where(rows < n_real, z - mean, 0.0)
        var = jnp.sum(zc * zc, axis=0, keepdims=True) * inv_n
        s = gamma_ref[...] * jax.lax.rsqrt(var + BN_EPS)          # folded scale
        t = beta_ref[...] - mean * s                              # folded shift
        a = jnp.maximum(z * s + t, 0.0)                           # ReLU

        out = jnp.dot(a.astype(jnp.bfloat16), w2_ref[...],
                      preferred_element_type=jnp.float32)
        out_ref[...] = (out + b2_ref[...]).astype(out_ref.dtype)


def gin_conv_random(x, src, dst, edge_attr, rand_edge, params):
    """Forward pass of GINConvRandom.

    x:          [N, H]   float32 node features
    src, dst:   [E]      int32 edge endpoints (message flows src -> dst)
    edge_attr:  [E, 3]   int32 bond integer features
    rand_edge:  [E, R]   float32 random edge vectors
    """
    n, hid = x.shape
    e = src.shape[0]

    h_pad = _round_up(hid, 128)        # lane-dense hidden dim
    n_pad = _round_up(n, 16)           # sublane alignment (covers f32 and bf16)

    # Edge tile adaptive to n_pad: target ~1 MiB of bf16 one-hot per step,
    # bounded to [128, 4096] and never larger than the (rounded) edge count.
    tile_cap = max(128, ((1 << 20) // (n_pad * 2)) // 128 * 128)
    tile_e = min(min(tile_cap, 4096), _round_up(e, 128))
    e_pad = _round_up(e, tile_e)
    grid = (e_pad // tile_e,)

    # ---- glue: BondEncoder (embedding lookups summed) + random edge features ----
    emb = jnp.zeros((e, hid - rand_edge.shape[1]), jnp.float32)
    for i, table in enumerate(params["bond_tables"]):
        emb = emb + jnp.take(table, edge_attr[:, i], axis=0)
    edge_emb = jnp.concatenate([emb, rand_edge], axis=-1)            # [E, H]

    # ---- pad to TPU-friendly shapes (zeros; padded edge indices -> -1) ----
    xp = jnp.zeros((n_pad, h_pad), jnp.float32).at[:n, :hid].set(x)
    eemb = jnp.zeros((e_pad, h_pad), jnp.bfloat16).at[:e, :hid].set(
        edge_emb.astype(jnp.bfloat16))
    src_row = jnp.full((1, e_pad), -1, jnp.int32).at[0, :e].set(src)
    dst_row = jnp.full((1, e_pad), -1, jnp.int32).at[0, :e].set(dst)

    def pad_mat_bf16(w):
        return jnp.zeros((h_pad, h_pad), jnp.bfloat16).at[:hid, :hid].set(
            w.astype(jnp.bfloat16))

    def pad_row(v):
        return jnp.zeros((1, h_pad), jnp.float32).at[:, :hid].set(v)

    w1 = pad_mat_bf16(params["w1"])
    w2 = pad_mat_bf16(params["w2"])
    gamma = pad_row(params["gamma"])
    beta = pad_row(params["beta"])
    b2 = pad_row(params["b2"])

    # ---- explicit VMEM budget (generation-aware clamp) ----
    budget = (
        n_pad * h_pad * 4            # x (f32, single buffer)
        + n_pad * h_pad * 2          # bf16 x scratch
        + n_pad * h_pad * 4          # out / accumulator (single buffer)
        + 2 * tile_e * h_pad * 2     # eemb bf16 (double buffered)
        + 2 * 2 * 8 * tile_e * 4     # src/dst rows (sublane padded, 2 bufs)
        + 2 * h_pad * h_pad * 2      # w1, w2 (bf16)
        + 3 * 8 * h_pad * 4          # gamma, beta, b2
        + 2 * n_pad * tile_e * 2     # one-hot intermediates
        + 2 * tile_e * h_pad * 4     # msg intermediates
        + 6 * n_pad * h_pad * 4      # finalize temporaries
    )
    try:
        vmem_cap = int(pltpu.get_tpu_info().vmem_capacity_bytes)
    except Exception:  # pragma: no cover - conservative fallback
        vmem_cap = 64 << 20
    vmem_limit = int(min(max(2 * budget, 32 << 20), int(0.9 * vmem_cap)))

    smem = pl.BlockSpec(memory_space=pltpu.MemorySpace.SMEM)

    def _run(single_buffer):
        if single_buffer:
            def const_spec(shape):
                return pl.BlockSpec(shape, lambda k: (0, 0),
                                    pipeline_mode=pl.Buffered(1))
        else:
            def const_spec(shape):
                return pl.BlockSpec(shape, lambda k: (0, 0))

        return pl.pallas_call(
            functools.partial(gin_conv_kernel, n_real=n),
            out_shape=jax.ShapeDtypeStruct((n_pad, h_pad), jnp.float32),
            grid_spec=pltpu.PrefetchScalarGridSpec(
                num_scalar_prefetch=0,
                grid=grid,
                in_specs=[
                    smem,                                              # eps scalar
                    pl.BlockSpec((1, tile_e), lambda k: (0, k)),       # src indices
                    pl.BlockSpec((1, tile_e), lambda k: (0, k)),       # dst indices
                    const_spec((n_pad, h_pad)),                        # x (resident)
                    pl.BlockSpec((tile_e, h_pad), lambda k: (k, 0)),   # edge_emb tile
                    const_spec((h_pad, h_pad)),                        # w1 (bf16)
                    const_spec((1, h_pad)),                            # gamma
                    const_spec((1, h_pad)),                            # beta
                    const_spec((h_pad, h_pad)),                        # w2 (bf16)
                    const_spec((1, h_pad)),                            # b2
                ],
                out_specs=const_spec((n_pad, h_pad)),
                scratch_shapes=[pltpu.VMEM((n_pad, h_pad), jnp.bfloat16)],
            ),
            compiler_params=pltpu.CompilerParams(
                dimension_semantics=("arbitrary",),   # edge axis is a reduction
                vmem_limit_bytes=vmem_limit),
        )(params["eps"], src_row, dst_row, xp, eemb, w1, gamma, beta, w2, b2)

    try:
        out = _run(True)
    except Exception:
        # Fallback in case single-buffered (Buffered(1)) blocks are rejected
        # by the installed Pallas version.
        out = _run(False)

    return out[:n, :hid]


def init_params(key, hidden, rand_vec_dim):
    """Deterministic parameter init matching the module's shapes."""
    emb_dim = hidden - rand_vec_dim
    bond_vocab_sizes = (5, 6, 2)  # OGB-style bond feature vocab sizes
    keys = jax.random.split(key, 4 + len(bond_vocab_sizes))
    params = {
        # nn.Linear(hidden, hidden) weights stored as [in, out] for h @ W
        "w1": 0.1 * jax.random.normal(keys[0], (hidden, hidden), jnp.float32),
        # b1 kept for shape fidelity but unused: it cancels under train-mode BN
        "b1": jnp.zeros((1, hidden), jnp.float32),
        "gamma": jnp.ones((1, hidden), jnp.float32),
        "beta": jnp.zeros((1, hidden), jnp.float32),
        "w2": 0.1 * jax.random.normal(keys[1], (hidden, hidden), jnp.float32),
        "b2": jnp.zeros((1, hidden), jnp.float32),
        "eps": jnp.zeros((1,), jnp.float32),
        "bond_tables": [
            0.1 * jax.random.normal(keys[2 + i], (v, emb_dim), jnp.float32)
            for i, v in enumerate(bond_vocab_sizes)
        ],
    }
    return params


if __name__ == "__main__":
    N, E, H, R = 16, 32, 32, 8  # nodes, edges, hidden_dim, random_vec_dim

    key = jax.random.PRNGKey(0)
    k_x, k_src, k_dst, k_attr, k_rand, k_par = jax.random.split(key, 6)

    x = jax.random.normal(k_x, (N, H), jnp.float32)
    src = jax.random.randint(k_src, (E,), 0, N, dtype=jnp.int32)
    dst = jax.random.randint(k_dst, (E,), 0, N, dtype=jnp.int32)
    edge_attr = jnp.stack(
        [jax.random.randint(k_attr, (E,), 0, v, dtype=jnp.int32)
         for v in (5, 6, 2)], axis=-1)                               # [E, 3]
    rand_edge = jax.random.normal(k_rand, (E, R), jnp.float32)

    params = init_params(k_par, H, R)

    out = gin_conv_random(x, src, dst, edge_attr, rand_edge, params)
    jax.block_until_ready(out)
    assert out.shape == (N, H) and out.dtype == jnp.float32
    assert bool(jnp.all(jnp.isfinite(out)))
    print("KERNEL_OK")
</pallas_src>

<mosaic_0001>
module attributes {stable_mosaic.version = 11 : i64} {
  func.func @gin_conv_kernel(%arg0: i32, %arg1: memref<1xf32, #tpu.memory_space<smem>>, %arg2: memref<1x128xi32, #tpu.memory_space<vmem>>, %arg3: memref<1x128xi32, #tpu.memory_space<vmem>>, %arg4: memref<16x128xf32, #tpu.memory_space<vmem>>, %arg5: memref<128x128xbf16, #tpu.memory_space<vmem>>, %arg6: memref<128x128xbf16, #tpu.memory_space<vmem>>, %arg7: memref<1x128xf32, #tpu.memory_space<vmem>>, %arg8: memref<1x128xf32, #tpu.memory_space<vmem>>, %arg9: memref<128x128xbf16, #tpu.memory_space<vmem>>, %arg10: memref<1x128xf32, #tpu.memory_space<vmem>>, %arg11: memref<16x128xf32, #tpu.memory_space<vmem>>, %arg12: memref<16x128xbf16, #tpu.memory_space<vmem>>) attributes {dimension_semantics = [#tpu.dimension_semantics<arbitrary>], iteration_bounds = array<i64: 1>, scalar_prefetch = 0 : i64, scratch_operands = 1 : i64, tpu.core_type = #tpu.core_type<tc>, window_params = [{transform_indices = @transform_0, window_bounds = array<i64: 1>}, {transform_indices = @transform_1, window_bounds = array<i64: 1, 128>}, {transform_indices = @transform_2, window_bounds = array<i64: 1, 128>}, {pipeline_mode = #tpu.pipeline_mode<synchronous>, transform_indices = @transform_3, window_bounds = array<i64: 16, 128>}, {transform_indices = @transform_4, window_bounds = array<i64: 128, 128>}, {pipeline_mode = #tpu.pipeline_mode<synchronous>, transform_indices = @transform_5, window_bounds = array<i64: 128, 128>}, {pipeline_mode = #tpu.pipeline_mode<synchronous>, transform_indices = @transform_6, window_bounds = array<i64: 1, 128>}, {pipeline_mode = #tpu.pipeline_mode<synchronous>, transform_indices = @transform_7, window_bounds = array<i64: 1, 128>}, {pipeline_mode = #tpu.pipeline_mode<synchronous>, transform_indices = @transform_8, window_bounds = array<i64: 128, 128>}, {pipeline_mode = #tpu.pipeline_mode<synchronous>, transform_indices = @transform_9, window_bounds = array<i64: 1, 128>}, {pipeline_mode = #tpu.pipeline_mode<synchronous>, transform_indices = @transform_10, window_bounds = array<i64: 16, 128>}]} {
    %c0_i32 = arith.constant 0 : i32
    %0 = arith.cmpi eq, %arg0, %c0_i32 : i32
    %1 = arith.extui %0 : i1 to i32
    %c0_i32_0 = arith.constant 0 : i32
    %2 = arith.cmpi ne, %1, %c0_i32_0 : i32
    scf.if %2 {
      %cst_16 = arith.constant 0.000000e+00 : f32
      %31 = vector.broadcast %cst_16 : f32 to vector<16x128xf32>
      %c0_17 = arith.constant 0 : index
      %c0_18 = arith.constant 0 : index
      %32 = vector.load %arg11[%c0_17, %c0_18] : memref<16x128xf32, #tpu.memory_space<vmem>>, vector<16x128xf32>
      tpu.vector_store %arg11[%c0_17, %c0_18], %31 {strides = array<i32>} : memref<16x128xf32, #tpu.memory_space<vmem>>, vector<16x128xf32>,
      %c0_19 = arith.constant 0 : index
      %c0_20 = arith.constant 0 : index
      %33 = vector.load %arg4[%c0_19, %c0_20] : memref<16x128xf32, #tpu.memory_space<vmem>>, vector<16x128xf32>
      %34 = arith.truncf %33 : vector<16x128xf32> to vector<16x128xbf16>
      %c0_21 = arith.constant 0 : index
      %c0_22 = arith.constant 0 : index
      %35 = vector.load %arg12[%c0_21, %c0_22] : memref<16x128xbf16, #tpu.memory_space<vmem>>, vector<16x128xbf16>
      tpu.vector_store %arg12[%c0_21, %c0_22], %34 {strides = array<i32>} : memref<16x128xbf16, #tpu.memory_space<vmem>>, vector<16x128xbf16>,
    } else {
    }
    %3 = tpu.iota {dimensions = array<i32: 0>} : vector<16x128xi32>
    %c0 = arith.constant 0 : index
    %c0_1 = arith.constant 0 : index
    %4 = vector.load %arg2[%c0, %c0_1] : memref<1x128xi32, #tpu.memory_space<vmem>>, vector<1x128xi32>
    %5 = vector.broadcast %4 : vector<1x128xi32> to vector<16x128xi32>
    %6 = arith.cmpi eq, %3, %5 : vector<16x128xi32>
    %7 = arith.extui %6 : vector<16x128xi1> to vector<16x128xi32>
    %8 = arith.sitofp %7 : vector<16x128xi32> to vector<16x128xf32>
    %9 = arith.truncf %8 : vector<16x128xf32> to vector<16x128xbf16>
    %c0_2 = arith.constant 0 : index
    %c0_3 = arith.constant 0 : index
    %10 = vector.load %arg3[%c0_2, %c0_3] : memref<1x128xi32, #tpu.memory_space<vmem>>, vector<1x128xi32>
    %11 = vector.broadcast %10 : vector<1x128xi32> to vector<16x128xi32>
    %12 = arith.cmpi eq, %3, %11 : vector<16x128xi32>
    %13 = arith.extui %12 : vector<16x128xi1> to vector<16x128xi32>
    %14 = arith.sitofp %13 : vector<16x128xi32> to vector<16x128xf32>
    %15 = arith.truncf %14 : vector<16x128xf32> to vector<16x128xbf16>
    %c0_4 = arith.constant 0 : index
    %c0_5 = arith.constant 0 : index
    %16 = vector.load %arg12[%c0_4, %c0_5] : memref<16x128xbf16, #tpu.memory_space<vmem>>, vector<16x128xbf16>
    %cst = arith.constant dense<0.000000e+00> : vector<128x128xf32>
    %17 = tpu.matmul %9, %16, %cst {dimension_numbers = #tpu.dot_dimension_numbers<[0], [0], [1], [1], [0, 1, 1, 1], [], []>} : vector<16x128xbf16>, vector<16x128xbf16>, vector<128x128xf32> -> vector<128x128xf32>
    %c0_6 = arith.constant 0 : index
    %c0_7 = arith.constant 0 : index
    %18 = vector.load %arg5[%c0_6, %c0_7] : memref<128x128xbf16, #tpu.memory_space<vmem>>, vector<128x128xbf16>
    %19 = arith.extf %18 : vector<128x128xbf16> to vector<128x128xf32>
    %20 = arith.addf %17, %19 : vector<128x128xf32>
    %cst_8 = arith.constant 0.000000e+00 : f32
    %21 = vector.broadcast %cst_8 : f32 to vector<128x128xf32>
    %22 = arith.maximumf %20, %21 : vector<128x128xf32>
    %c0_9 = arith.constant 0 : index
    %c0_10 = arith.constant 0 : index
    %23 = vector.load %arg11[%c0_9, %c0_10] : memref<16x128xf32, #tpu.memory_space<vmem>>, vector<16x128xf32>
    %24 = arith.truncf %22 : vector<128x128xf32> to vector<128x128xbf16>
    %cst_11 = arith.constant dense<0.000000e+00> : vector<16x128xf32>
    %25 = tpu.matmul %15, %24, %cst_11 {dimension_numbers = #tpu.dot_dimension_numbers<[1], [0], [0], [1], [0, 0, 1, 1], [], []>} : vector<16x128xbf16>, vector<128x128xbf16>, vector<16x128xf32> -> vector<16x128xf32>
    %26 = arith.addf %23, %25 : vector<16x128xf32>
    %c0_12 = arith.constant 0 : index
    %c0_13 = arith.constant 0 : index
    %27 = vector.load %arg11[%c0_12, %c0_13] : memref<16x128xf32, #tpu.memory_space<vmem>>, vector<16x128xf32>
    tpu.vector_store %arg11[%c0_12, %c0_13], %26 {strides = array<i32>} : memref<16x128xf32, #tpu.memory_space<vmem>>, vector<16x128xf32>,
    %c0_i32_14 = arith.constant 0 : i32
    %28 = arith.cmpi eq, %arg0, %c0_i32_14 : i32
    %29 = arith.extui %28 : i1 to i32
    %c0_i32_15 = arith.constant 0 : i32
    %30 = arith.cmpi ne, %29, %c0_i32_15 : i32
    scf.if %30 {
      %c0_16 = arith.constant 0 : index
      %c0_17 = arith.constant 0 : index
      %31 = vector.load %arg11[%c0_16, %c0_17] : memref<16x128xf32, #tpu.memory_space<vmem>>, vector<16x128xf32>
      %c0_18 = arith.constant 0 : index
      %32 = memref.load %arg1[%c0_18] : memref<1xf32, #tpu.memory_space<smem>>
      %cst_19 = arith.constant 1.000000e+00 : f32
      %33 = arith.addf %cst_19, %32 : f32
      %c0_20 = arith.constant 0 : index
      %c0_21 = arith.constant 0 : index
      %34 = vector.load %arg4[%c0_20, %c0_21] : memref<16x128xf32, #tpu.memory_space<vmem>>, vector<16x128xf32>
      %35 = vector.broadcast %33 : f32 to vector<16x128xf32>
      %36 = arith.mulf %35, %34 : vector<16x128xf32>
      %37 = arith.addf %36, %31 : vector<16x128xf32>
      %38 = arith.truncf %37 : vector<16x128xf32> to vector<16x128xbf16>
      %c0_22 = arith.constant 0 : index
      %c0_23 = arith.constant 0 : index
      %39 = vector.load %arg6[%c0_22, %c0_23] : memref<128x128xbf16, #tpu.memory_space<vmem>>, vector<128x128xbf16>
      %cst_24 = arith.constant dense<0.000000e+00> : vector<16x128xf32>
      %40 = tpu.matmul %38, %39, %cst_24 {dimension_numbers = #tpu.dot_dimension_numbers<[1], [0], [0], [1], [0, 0, 1, 1], [], []>} : vector<16x128xbf16>, vector<128x128xbf16>, vector<16x128xf32> -> vector<16x128xf32>
      %cst_25 = arith.constant dense<0.000000e+00> : vector<128xf32>
      %41 = vector.multi_reduction <add>, %40, %cst_25 [0] : vector<16x128xf32> to vector<128xf32>
      %42 = vector.shape_cast %41 : vector<128xf32> to vector<1x128xf32>
      %cst_26 = arith.constant 6.250000e-02 : f32
      %43 = vector.broadcast %cst_26 : f32 to vector<1x128xf32>
      %44 = arith.mulf %42, %43 : vector<1x128xf32>
      %45 = vector.broadcast %44 : vector<1x128xf32> to vector<16x128xf32>
      %46 = arith.subf %40, %45 : vector<16x128xf32>
      %47 = arith.mulf %46, %46 : vector<16x128xf32>
      %cst_27 = arith.constant dense<0.000000e+00> : vector<128xf32>
      %48 = vector.multi_reduction <add>, %47, %cst_27 [0] : vector<16x128xf32> to vector<128xf32>
      %49 = vector.shape_cast %48 : vector<128xf32> to vector<1x128xf32>
      %cst_28 = arith.constant 6.250000e-02 : f32
      %50 = vector.broadcast %cst_28 : f32 to vector<1x128xf32>
      %51 = arith.mulf %49, %50 : vector<1x128xf32>
      %c0_29 = arith.constant 0 : index
      %c0_30 = arith.constant 0 : index
      %52 = vector.load %arg7[%c0_29, %c0_30] : memref<1x128xf32, #tpu.memory_space<vmem>>, vector<1x128xf32>
      %cst_31 = arith.constant 9.99999974E-6 : f32
      %53 = vector.broadcast %cst_31 : f32 to vector<1x128xf32>
      %54 = arith.addf %51, %53 : vector<1x128xf32>
      %55 = math.rsqrt %54 : vector<1x128xf32>
      %56 = arith.mulf %52, %55 : vector<1x128xf32>
      %c0_32 = arith.constant 0 : index
      %c0_33 = arith.constant 0 : index
      %57 = vector.load %arg8[%c0_32, %c0_33] : memref<1x128xf32, #tpu.memory_space<vmem>>, vector<1x128xf32>
      %58 = arith.mulf %44, %56 : vector<1x128xf32>
      %59 = arith.subf %57, %58 : vector<1x128xf32>
      %60 = vector.broadcast %56 : vector<1x128xf32> to vector<16x128xf32>
      %61 = arith.mulf %40, %60 : vector<16x128xf32>
      %62 = vector.broadcast %59 : vector<1x128xf32> to vector<16x128xf32>
      %63 = arith.addf %61, %62 : vector<16x128xf32>
      %cst_34 = arith.constant 0.000000e+00 : f32
      %64 = vector.broadcast %cst_34 : f32 to vector<16x128xf32>
      %65 = arith.maximumf %63, %64 : vector<16x128xf32>
      %66 = arith.truncf %65 : vector<16x128xf32> to vector<16x128xbf16>
      %c0_35 = arith.constant 0 : index
      %c0_36 = arith.constant 0 : index
      %67 = vector.load %arg9[%c0_35, %c0_36] : memref<128x128xbf16, #tpu.memory_space<vmem>>, vector<128x128xbf16>
      %cst_37 = arith.constant dense<0.000000e+00> : vector<16x128xf32>
      %68 = tpu.matmul %66, %67, %cst_37 {dimension_numbers = #tpu.dot_dimension_numbers<[1], [0], [0], [1], [0, 0, 1, 1], [], []>} : vector<16x128xbf16>, vector<128x128xbf16>, vector<16x128xf32> -> vector<16x128xf32>
      %c0_38 = arith.constant 0 : index
      %c0_39 = arith.constant 0 : index
      %69 = vector.load %arg10[%c0_38, %c0_39] : memref<1x128xf32, #tpu.memory_space<vmem>>, vector<1x128xf32>
      %70 = vector.broadcast %69 : vector<1x128xf32> to vector<16x128xf32>
      %71 = arith.addf %68, %70 : vector<16x128xf32>
      %c0_40 = arith.constant 0 : index
      %c0_41 = arith.constant 0 : index
      %72 = vector.load %arg11[%c0_40, %c0_41] : memref<16x128xf32, #tpu.memory_space<vmem>>, vector<16x128xf32>
      tpu.vector_store %arg11[%c0_40, %c0_41], %71 {strides = array<i32>} : memref<16x128xf32, #tpu.memory_space<vmem>>, vector<16x128xf32>,
    } else {
    }
    return
  }
  func.func @transform_0(%arg0: i32) -> i32 {
    %c0_i32 = arith.constant 0 : i32
    %c0_i32_0 = arith.constant 0 : i32
    return %c0_i32 : i32
  }
  func.func @transform_1(%arg0: i32) -> (i32, i32) {
    %c0_i32 = arith.constant 0 : i32
    %c0_i32_0 = arith.constant 0 : i32
    return %c0_i32, %arg0 : i32, i32
  }
  func.func @transform_2(%arg0: i32) -> (i32, i32) {
    %c0_i32 = arith.constant 0 : i32
    %c0_i32_0 = arith.constant 0 : i32
    return %c0_i32, %arg0 : i32, i32
  }
  func.func @transform_3(%arg0: i32) -> (i32, i32) {
    %c0_i32 = arith.constant 0 : i32
    %c0_i32_0 = arith.constant 0 : i32
    %c0_i32_1 = arith.constant 0 : i32
    return %c0_i32, %c0_i32_0 : i32, i32
  }
  func.func @transform_4(%arg0: i32) -> (i32, i32) {
    %c0_i32 = arith.constant 0 : i32
    %c0_i32_0 = arith.constant 0 : i32
    return %arg0, %c0_i32 : i32, i32
  }
  func.func @transform_5(%arg0: i32) -> (i32, i32) {
    %c0_i32 = arith.constant 0 : i32
    %c0_i32_0 = arith.constant 0 : i32
    %c0_i32_1 = arith.constant 0 : i32
    return %c0_i32, %c0_i32_0 : i32, i32
  }
  func.func @transform_6(%arg0: i32) -> (i32, i32) {
    %c0_i32 = arith.constant 0 : i32
    %c0_i32_0 = arith.constant 0 : i32
    %c0_i32_1 = arith.constant 0 : i32
    return %c0_i32, %c0_i32_0 : i32, i32
  }
  func.func @transform_7(%arg0: i32) -> (i32, i32) {
    %c0_i32 = arith.constant 0 : i32
    %c0_i32_0 = arith.constant 0 : i32
    %c0_i32_1 = arith.constant 0 : i32
    return %c0_i32, %c0_i32_0 : i32, i32
  }
  func.func @transform_8(%arg0: i32) -> (i32, i32) {
    %c0_i32 = arith.constant 0 : i32
    %c0_i32_0 = arith.constant 0 : i32
    %c0_i32_1 = arith.constant 0 : i32
    return %c0_i32, %c0_i32_0 : i32, i32
  }
  func.func @transform_9(%arg0: i32) -> (i32, i32) {
    %c0_i32 = arith.constant 0 : i32
    %c0_i32_0 = arith.constant 0 : i32
    %c0_i32_1 = arith.constant 0 : i32
    return %c0_i32, %c0_i32_0 : i32, i32
  }
  func.func @transform_10(%arg0: i32) -> (i32, i32) {
    %c0_i32 = arith.constant 0 : i32
    %c0_i32_0 = arith.constant 0 : i32
    %c0_i32_1 = arith.constant 0 : i32
    return %c0_i32, %c0_i32_0 : i32, i32
  }
}

module attributes {stable_mosaic.version = 11 : i64} {
  func.func @gin_conv_kernel(%arg0: i32, %arg1: memref<1xf32, #tpu.memory_space<smem>>, %arg2: memref<1x128xi32, #tpu.memory_space<vmem>>, %arg3: memref<1x128xi32, #tpu.memory_space<vmem>>, %arg4: memref<16x128xf32, #tpu.memory_space<vmem>>, %arg5: memref<128x128xbf16, #tpu.memory_space<vmem>>, %arg6: memref<128x128xbf16, #tpu.memory_space<vmem>>, %arg7: memref<1x128xf32, #tpu.memory_space<vmem>>, %arg8: memref<1x128xf32, #tpu.memory_space<vmem>>, %arg9: memref<128x128xbf16, #tpu.memory_space<vmem>>, %arg10: memref<1x128xf32, #tpu.memory_space<vmem>>, %arg11: memref<16x128xf32, #tpu.memory_space<vmem>>, %arg12: memref<16x128xbf16, #tpu.memory_space<vmem>>) attributes {dimension_semantics = [#tpu.dimension_semantics<arbitrary>], iteration_bounds = array<i64: 1>, scalar_prefetch = 0 : i64, scratch_operands = 1 : i64, tpu.core_type = #tpu.core_type<tc>, window_params = [{transform_indices = @transform_0, window_bounds = array<i64: 1>}, {transform_indices = @transform_1, window_bounds = array<i64: 1, 128>}, {transform_indices = @transform_2, window_bounds = array<i64: 1, 128>}, {pipeline_mode = #tpu.pipeline_mode<synchronous>, transform_indices = @transform_3, window_bounds = array<i64: 16, 128>}, {transform_indices = @transform_4, window_bounds = array<i64: 128, 128>}, {pipeline_mode = #tpu.pipeline_mode<synchronous>, transform_indices = @transform_5, window_bounds = array<i64: 128, 128>}, {pipeline_mode = #tpu.pipeline_mode<synchronous>, transform_indices = @transform_6, window_bounds = array<i64: 1, 128>}, {pipeline_mode = #tpu.pipeline_mode<synchronous>, transform_indices = @transform_7, window_bounds = array<i64: 1, 128>}, {pipeline_mode = #tpu.pipeline_mode<synchronous>, transform_indices = @transform_8, window_bounds = array<i64: 128, 128>}, {pipeline_mode = #tpu.pipeline_mode<synchronous>, transform_indices = @transform_9, window_bounds = array<i64: 1, 128>}, {pipeline_mode = #tpu.pipeline_mode<synchronous>, transform_indices = @transform_10, window_bounds = array<i64: 16, 128>}]} {
    %c0_i32 = arith.constant 0 : i32
    %0 = arith.cmpi eq, %arg0, %c0_i32 : i32
    %1 = arith.extui %0 : i1 to i32
    %c0_i32_0 = arith.constant 0 : i32
    %2 = arith.cmpi ne, %1, %c0_i32_0 : i32
    scf.if %2 {
      %cst_16 = arith.constant 0.000000e+00 : f32
      %31 = vector.broadcast %cst_16 : f32 to vector<16x128xf32>
      %c0_17 = arith.constant 0 : index
      %c0_18 = arith.constant 0 : index
      %32 = vector.load %arg11[%c0_17, %c0_18] : memref<16x128xf32, #tpu.memory_space<vmem>>, vector<16x128xf32>
      tpu.vector_store %arg11[%c0_17, %c0_18], %31 {strides = array<i32>} : memref<16x128xf32, #tpu.memory_space<vmem>>, vector<16x128xf32>,
      %c0_19 = arith.constant 0 : index
      %c0_20 = arith.constant 0 : index
      %33 = vector.load %arg4[%c0_19, %c0_20] : memref<16x128xf32, #tpu.memory_space<vmem>>, vector<16x128xf32>
      %34 = arith.truncf %33 : vector<16x128xf32> to vector<16x128xbf16>
      %c0_21 = arith.constant 0 : index
      %c0_22 = arith.constant 0 : index
      %35 = vector.load %arg12[%c0_21, %c0_22] : memref<16x128xbf16, #tpu.memory_space<vmem>>, vector<16x128xbf16>
      tpu.vector_store %arg12[%c0_21, %c0_22], %34 {strides = array<i32>} : memref<16x128xbf16, #tpu.memory_space<vmem>>, vector<16x128xbf16>,
    } else {
    }
    %3 = tpu.iota {dimensions = array<i32: 0>} : vector<16x128xi32>
    %c0 = arith.constant 0 : index
    %c0_1 = arith.constant 0 : index
    %4 = vector.load %arg2[%c0, %c0_1] : memref<1x128xi32, #tpu.memory_space<vmem>>, vector<1x128xi32>
    %5 = vector.broadcast %4 : vector<1x128xi32> to vector<16x128xi32>
    %6 = arith.cmpi eq, %3, %5 : vector<16x128xi32>
    %7 = arith.extui %6 : vector<16x128xi1> to vector<16x128xi32>
    %8 = arith.sitofp %7 : vector<16x128xi32> to vector<16x128xf32>
    %9 = arith.truncf %8 : vector<16x128xf32> to vector<16x128xbf16>
    %c0_2 = arith.constant 0 : index
    %c0_3 = arith.constant 0 : index
    %10 = vector.load %arg3[%c0_2, %c0_3] : memref<1x128xi32, #tpu.memory_space<vmem>>, vector<1x128xi32>
    %11 = vector.broadcast %10 : vector<1x128xi32> to vector<16x128xi32>
    %12 = arith.cmpi eq, %3, %11 : vector<16x128xi32>
    %13 = arith.extui %12 : vector<16x128xi1> to vector<16x128xi32>
    %14 = arith.sitofp %13 : vector<16x128xi32> to vector<16x128xf32>
    %15 = arith.truncf %14 : vector<16x128xf32> to vector<16x128xbf16>
    %c0_4 = arith.constant 0 : index
    %c0_5 = arith.constant 0 : index
    %16 = vector.load %arg12[%c0_4, %c0_5] : memref<16x128xbf16, #tpu.memory_space<vmem>>, vector<16x128xbf16>
    %cst = arith.constant dense<0.000000e+00> : vector<128x128xf32>
    %17 = tpu.matmul %9, %16, %cst {dimension_numbers = #tpu.dot_dimension_numbers<[0], [0], [1], [1], [0, 1, 1, 1], [], []>} : vector<16x128xbf16>, vector<16x128xbf16>, vector<128x128xf32> -> vector<128x128xf32>
    %c0_6 = arith.constant 0 : index
    %c0_7 = arith.constant 0 : index
    %18 = vector.load %arg5[%c0_6, %c0_7] : memref<128x128xbf16, #tpu.memory_space<vmem>>, vector<128x128xbf16>
    %19 = arith.extf %18 : vector<128x128xbf16> to vector<128x128xf32>
    %20 = arith.addf %17, %19 : vector<128x128xf32>
    %cst_8 = arith.constant 0.000000e+00 : f32
    %21 = vector.broadcast %cst_8 : f32 to vector<128x128xf32>
    %22 = arith.maximumf %20, %21 : vector<128x128xf32>
    %c0_9 = arith.constant 0 : index
    %c0_10 = arith.constant 0 : index
    %23 = vector.load %arg11[%c0_9, %c0_10] : memref<16x128xf32, #tpu.memory_space<vmem>>, vector<16x128xf32>
    %24 = arith.truncf %22 : vector<128x128xf32> to vector<128x128xbf16>
    %cst_11 = arith.constant dense<0.000000e+00> : vector<16x128xf32>
    %25 = tpu.matmul %15, %24, %cst_11 {dimension_numbers = #tpu.dot_dimension_numbers<[1], [0], [0], [1], [0, 0, 1, 1], [], []>} : vector<16x128xbf16>, vector<128x128xbf16>, vector<16x128xf32> -> vector<16x128xf32>
    %26 = arith.addf %23, %25 : vector<16x128xf32>
    %c0_12 = arith.constant 0 : index
    %c0_13 = arith.constant 0 : index
    %27 = vector.load %arg11[%c0_12, %c0_13] : memref<16x128xf32, #tpu.memory_space<vmem>>, vector<16x128xf32>
    tpu.vector_store %arg11[%c0_12, %c0_13], %26 {strides = array<i32>} : memref<16x128xf32, #tpu.memory_space<vmem>>, vector<16x128xf32>,
    %c0_i32_14 = arith.constant 0 : i32
    %28 = arith.cmpi eq, %arg0, %c0_i32_14 : i32
    %29 = arith.extui %28 : i1 to i32
    %c0_i32_15 = arith.constant 0 : i32
    %30 = arith.cmpi ne, %29, %c0_i32_15 : i32
    scf.if %30 {
      %c0_16 = arith.constant 0 : index
      %c0_17 = arith.constant 0 : index
      %31 = vector.load %arg11[%c0_16, %c0_17] : memref<16x128xf32, #tpu.memory_space<vmem>>, vector<16x128xf32>
      %c0_18 = arith.constant 0 : index
      %32 = memref.load %arg1[%c0_18] : memref<1xf32, #tpu.memory_space<smem>>
      %cst_19 = arith.constant 1.000000e+00 : f32
      %33 = arith.addf %cst_19, %32 : f32
      %c0_20 = arith.constant 0 : index
      %c0_21 = arith.constant 0 : index
      %34 = vector.load %arg4[%c0_20, %c0_21] : memref<16x128xf32, #tpu.memory_space<vmem>>, vector<16x128xf32>
      %35 = vector.broadcast %33 : f32 to vector<16x128xf32>
      %36 = arith.mulf %35, %34 : vector<16x128xf32>
      %37 = arith.addf %36, %31 : vector<16x128xf32>
      %38 = arith.truncf %37 : vector<16x128xf32> to vector<16x128xbf16>
      %c0_22 = arith.constant 0 : index
      %c0_23 = arith.constant 0 : index
      %39 = vector.load %arg6[%c0_22, %c0_23] : memref<128x128xbf16, #tpu.memory_space<vmem>>, vector<128x128xbf16>
      %cst_24 = arith.constant dense<0.000000e+00> : vector<16x128xf32>
      %40 = tpu.matmul %38, %39, %cst_24 {dimension_numbers = #tpu.dot_dimension_numbers<[1], [0], [0], [1], [0, 0, 1, 1], [], []>} : vector<16x128xbf16>, vector<128x128xbf16>, vector<16x128xf32> -> vector<16x128xf32>
      %cst_25 = arith.constant dense<0.000000e+00> : vector<128xf32>
      %41 = vector.multi_reduction <add>, %40, %cst_25 [0] : vector<16x128xf32> to vector<128xf32>
      %42 = vector.shape_cast %41 : vector<128xf32> to vector<1x128xf32>
      %cst_26 = arith.constant 6.250000e-02 : f32
      %43 = vector.broadcast %cst_26 : f32 to vector<1x128xf32>
      %44 = arith.mulf %42, %43 : vector<1x128xf32>
      %45 = vector.broadcast %44 : vector<1x128xf32> to vector<16x128xf32>
      %46 = arith.subf %40, %45 : vector<16x128xf32>
      %47 = arith.mulf %46, %46 : vector<16x128xf32>
      %cst_27 = arith.constant dense<0.000000e+00> : vector<128xf32>
      %48 = vector.multi_reduction <add>, %47, %cst_27 [0] : vector<16x128xf32> to vector<128xf32>
      %49 = vector.shape_cast %48 : vector<128xf32> to vector<1x128xf32>
      %cst_28 = arith.constant 6.250000e-02 : f32
      %50 = vector.broadcast %cst_28 : f32 to vector<1x128xf32>
      %51 = arith.mulf %49, %50 : vector<1x128xf32>
      %c0_29 = arith.constant 0 : index
      %c0_30 = arith.constant 0 : index
      %52 = vector.load %arg7[%c0_29, %c0_30] : memref<1x128xf32, #tpu.memory_space<vmem>>, vector<1x128xf32>
      %cst_31 = arith.constant 9.99999974E-6 : f32
      %53 = vector.broadcast %cst_31 : f32 to vector<1x128xf32>
      %54 = arith.addf %51, %53 : vector<1x128xf32>
      %55 = math.rsqrt %54 : vector<1x128xf32>
      %56 = arith.mulf %52, %55 : vector<1x128xf32>
      %c0_32 = arith.constant 0 : index
      %c0_33 = arith.constant 0 : index
      %57 = vector.load %arg8[%c0_32, %c0_33] : memref<1x128xf32, #tpu.memory_space<vmem>>, vector<1x128xf32>
      %58 = arith.mulf %44, %56 : vector<1x128xf32>
      %59 = arith.subf %57, %58 : vector<1x128xf32>
      %60 = vector.broadcast %56 : vector<1x128xf32> to vector<16x128xf32>
      %61 = arith.mulf %40, %60 : vector<16x128xf32>
      %62 = vector.broadcast %59 : vector<1x128xf32> to vector<16x128xf32>
      %63 = arith.addf %61, %62 : vector<16x128xf32>
      %cst_34 = arith.constant 0.000000e+00 : f32
      %64 = vector.broadcast %cst_34 : f32 to vector<16x128xf32>
      %65 = arith.maximumf %63, %64 : vector<16x128xf32>
      %66 = arith.truncf %65 : vector<16x128xf32> to vector<16x128xbf16>
      %c0_35 = arith.constant 0 : index
      %c0_36 = arith.constant 0 : index
      %67 = vector.load %arg9[%c0_35, %c0_36] : memref<128x128xbf16, #tpu.memory_space<vmem>>, vector<128x128xbf16>
      %cst_37 = arith.constant dense<0.000000e+00> : vector<16x128xf32>
      %68 = tpu.matmul %66, %67, %cst_37 {dimension_numbers = #tpu.dot_dimension_numbers<[1], [0], [0], [1], [0, 0, 1, 1], [], []>} : vector<16x128xbf16>, vector<128x128xbf16>, vector<16x128xf32> -> vector<16x128xf32>
      %c0_38 = arith.constant 0 : index
      %c0_39 = arith.constant 0 : index
      %69 = vector.load %arg10[%c0_38, %c0_39] : memref<1x128xf32, #tpu.memory_space<vmem>>, vector<1x128xf32>
      %70 = vector.broadcast %69 : vector<1x128xf32> to vector<16x128xf32>
      %71 = arith.addf %68, %70 : vector<16x128xf32>
      %c0_40 = arith.constant 0 : index
      %c0_41 = arith.constant 0 : index
      %72 = vector.load %arg11[%c0_40, %c0_41] : memref<16x128xf32, #tpu.memory_space<vmem>>, vector<16x128xf32>
      tpu.vector_store %arg11[%c0_40, %c0_41], %71 {strides = array<i32>} : memref<16x128xf32, #tpu.memory_space<vmem>>, vector<16x128xf32>,
    } else {
    }
    return
  }
  func.func @transform_0(%arg0: i32) -> i32 {
    %c0_i32 = arith.constant 0 : i32
    %c0_i32_0 = arith.constant 0 : i32
    return %c0_i32 : i32
  }
  func.func @transform_1(%arg0: i32) -> (i32, i32) {
    %c0_i32 = arith.constant 0 : i32
    %c0_i32_0 = arith.constant 0 : i32
    return %c0_i32, %arg0 : i32, i32
  }
  func.func @transform_2(%arg0: i32) -> (i32, i32) {
    %c0_i32 = arith.constant 0 : i32
    %c0_i32_0 = arith.constant 0 : i32
    return %c0_i32, %arg0 : i32, i32
  }
  func.func @transform_3(%arg0: i32) -> (i32, i32) {
    %c0_i32 = arith.constant 0 : i32
    %c0_i32_0 = arith.constant 0 : i32
    %c0_i32_1 = arith.constant 0 : i32
    return %c0_i32, %c0_i32_0 : i32, i32
  }
  func.func @transform_4(%arg0: i32) -> (i32, i32) {
    %c0_i32 = arith.constant 0 : i32
    %c0_i32_0 = arith.constant 0 : i32
    return %arg0, %c0_i32 : i32, i32
  }
  func.func @transform_5(%arg0: i32) -> (i32, i32) {
    %c0_i32 = arith.constant 0 : i32
    %c0_i32_0 = arith.constant 0 : i32
    %c0_i32_1 = arith.constant 0 : i32
    return %c0_i32, %c0_i32_0 : i32, i32
  }
  func.func @transform_6(%arg0: i32) -> (i32, i32) {
    %c0_i32 = arith.constant 0 : i32
    %c0_i32_0 = arith.constant 0 : i32
    %c0_i32_1 = arith.constant 0 : i32
    return %c0_i32, %c0_i32_0 : i32, i32
  }
  func.func @transform_7(%arg0: i32) -> (i32, i32) {
    %c0_i32 = arith.constant 0 : i32
    %c0_i32_0 = arith.constant 0 : i32
    %c0_i32_1 = arith.constant 0 : i32
    return %c0_i32, %c0_i32_0 : i32, i32
  }
  func.func @transform_8(%arg0: i32) -> (i32, i32) {
    %c0_i32 = arith.constant 0 : i32
    %c0_i32_0 = arith.constant 0 : i32
    %c0_i32_1 = arith.constant 0 : i32
    return %c0_i32, %c0_i32_0 : i32, i32
  }
  func.func @transform_9(%arg0: i32) -> (i32, i32) {
    %c0_i32 = arith.constant 0 : i32
    %c0_i32_0 = arith.constant 0 : i32
    %c0_i32_1 = arith.constant 0 : i32
    return %c0_i32, %c0_i32_0 : i32, i32
  }
  func.func @transform_10(%arg0: i32) -> (i32, i32) {
    %c0_i32 = arith.constant 0 : i32
    %c0_i32_0 = arith.constant 0 : i32
    %c0_i32_1 = arith.constant 0 : i32
    return %c0_i32, %c0_i32_0 : i32, i32
  }
}

</mosaic_0001>

<bundles_post_ra>
// kernel: tpu_custom_call.1
= control target key start
LH: loop header
LB: loop body
LE: loop exit
PB: predicated region body
PF: predicated region fallthrough
CT: control target
= control target key end

     0   :  { %16 = vsyncpa [#allocation5], 0  ;;  %s1231_s0 = inlined_call_operand.<no memory space> [shape: f32[1], index: 0, kind: input, shape index: {}]   ;;  %s1232_s1 = inlined_call_operand.vmem [shape: s32[1,128], index: 1, kind: input, shape index: {}]   ;;  %s1233_s2 = inlined_call_operand.vmem [shape: s32[1,128], index: 2, kind: input, shape index: {}]   ;;  %s1234_s3 = inlined_call_operand.hbm [shape: f32[16,128], index: 3, kind: input, shape index: {}]   ;;  %s1235_s4 = inlined_call_operand.hbm [shape: bf16[128,128], index: 4, kind: input, shape index: {}]   ;;  %s1236_s5 = inlined_call_operand.hbm [shape: bf16[128,128], index: 5, kind: input, shape index: {}]   ;;  %s1237_s6 = inlined_call_operand.vmem [shape: f32[1,128], index: 6, kind: input, shape index: {}]   ;;  %s1238_s7 = inlined_call_operand.vmem [shape: f32[1,128], index: 7, kind: input, shape index: {}]   ;;  %s1239_s8 = inlined_call_operand.hbm [shape: bf16[128,128], index: 8, kind: input, shape index: {}]   ;;  %s1240_s9 = inlined_call_operand.vmem [shape: f32[1,128], index: 9, kind: input, shape index: {}]   ;;  %s1241_s10 = inlined_call_operand.hbm [shape: f32[16,128], index: 10, kind: output, shape index: {}]  }
   0x1   :  { %17 = vsyncpa [#allocation8], 0 }
   0x2   :  { %18 = vsyncpa [#allocation11], 0 }
   0x3   :  { %19 = vsyncpa [#allocation6], 0  ;;  %s1006_s13 = smov [#allocation7]   ;;  %s888_s17 = scalar_lea.hbm %s1235_s4, 1024 }
   0x4   :  { %s43_s14 = sshll.u32 %s1006_s13, 4  ;;  %p889_p0 = scmp.ne.s32.totalorder %s1235_s4, %s888_s17  ;;  %s44_s14 = int_to_ptr.vmem [resolvable:$true] %s43_s14 }
   0x5   :  { %p892_p1 = scmp.lt.u32.totalorder %s888_s17, %s1235_s4 }
   0x7   :  { %p894_p2 = pnand %p892_p1, %p889_p0 }
   0x9   :  { %897 = shalt.err (!%p894_p2)
}
   0xa   :  { %s898_s22 = scalar_lea.vmem %s44_s14, 1024  ;;  %p903_p4 = scmp.lt.s32.totalorder %s44_s14, %s44_s14 }
   0xb   :  { %p899_p3 = scmp.ne.s32.totalorder %s44_s14, %s898_s22  ;;  %p904_p5 = scmp.lt.s32.totalorder %s898_s22, %s898_s22 }
   0xd   :  { %p905_p6 = por %p904_p5, %p903_p4 }
   0xf   :  { %p906_p7 = pnand %p905_p6, %p899_p3 }
  0x11   :  { %909 = shalt.err (!%p906_p7)
}
  0x12   :  { %s1007_s23 = smov 64   ;;  %s1008_s24 = smov 4  }
  0x13   :  { %49 = dma.hbm_to_vmem [thread:$0]  %s1235_s4, 1024, %s44_s14, [#allocation8], %s1007_s23, %s1007_s23, %s1008_s24  }
  0x14   :  { %s1009_s27 = smov [#allocation4]   ;;  %s910_s11 = scalar_lea.hbm %s1234_s3, 256 }
  0x15   :  { %s31_s28 = sshll.u32 %s1009_s27, 4  ;;  %p911_p8 = scmp.ne.s32.totalorder %s1234_s3, %s910_s11  ;;  %s32_s28 = int_to_ptr.vmem [resolvable:$true] %s31_s28 }
  0x16   :  { %p914_p9 = scmp.lt.u32.totalorder %s910_s11, %s1234_s3 }
  0x18   :  { %p916_p10 = pnand %p914_p9, %p911_p8 }
  0x1a   :  { %919 = shalt.err (!%p916_p10)
}
  0x1b   :  { %s920_s17 = scalar_lea.vmem %s32_s28, 256  ;;  %p925_p12 = scmp.lt.s32.totalorder %s32_s28, %s32_s28 }
  0x1c   :  { %p921_p11 = scmp.ne.s32.totalorder %s32_s28, %s920_s17  ;;  %p926_p13 = scmp.lt.s32.totalorder %s920_s17, %s920_s17 }
  0x1e   :  { %p927_p0 = por %p926_p13, %p925_p12 }
  0x20   :  { %p928_p1 = pnand %p927_p0, %p921_p11 }
  0x22   :  { %931 = shalt.err (!%p928_p1)
}
  0x23   :  { %s1010_s4 = smov 128   ;;  %s1011_s14 = smov 8  }
  0x24   :  { %37 = dma.hbm_to_vmem [thread:$0]  %s1234_s3, 256, %s32_s28, [#allocation5], %s1010_s4, %s1010_s4, %s1011_s14  }
  0x25   :  { %s1012_s20 = smov [#allocation9]   ;;  %s1013_s22 = smov [#allocation10]  }
  0x26   :  { %s55_s21 = sshll.u32 %s1012_s20, 4  ;;  %s71_s25 = sshll.u32 %s1013_s22, 4  ;;  %s56_s21 = int_to_ptr.vmem [resolvable:$true] %s55_s21  ;;  %s1103_s25 = int_to_ptr.vmem [resolvable:$true] %s71_s25 }
  0x27   :  { %s932_s29 = scalar_lea.hbm %s1236_s5, 1024 }
  0x28   :  { %p933_p2 = scmp.ne.s32.totalorder %s1236_s5, %s932_s29  ;;  %p936_p3 = scmp.lt.u32.totalorder %s932_s29, %s1236_s5 }
  0x2a   :  { %p938_p4 = pnand %p936_p3, %p933_p2 }
  0x2c   :  { %941 = shalt.err (!%p938_p4)
}
  0x2d   :  { %s942_s3 = scalar_lea.vmem %s56_s21, 1024  ;;  %p947_p6 = scmp.lt.s32.totalorder %s56_s21, %s56_s21 }
  0x2e   :  { %p943_p5 = scmp.ne.s32.totalorder %s56_s21, %s942_s3  ;;  %p948_p7 = scmp.lt.s32.totalorder %s942_s3, %s942_s3 }
  0x30   :  { %p949_p8 = por %p948_p7, %p947_p6 }
  0x32   :  { %p950_p9 = pnand %p949_p8, %p943_p5 }
  0x34   :  { %953 = shalt.err (!%p950_p9)
}
  0x35   :  { %61 = dma.hbm_to_vmem [thread:$0]  %s1236_s5, 1024, %s56_s21, [#allocation8], %s1007_s23, %s1007_s23, %s1008_s24  }
  0x36   :  { %s954_s18 = scalar_lea.hbm %s1239_s8, 1024 }
  0x37   :  { %p955_p10 = scmp.ne.s32.totalorder %s1239_s8, %s954_s18  ;;  %p958_p11 = scmp.lt.u32.totalorder %s954_s18, %s1239_s8 }
  0x39   :  { %p960_p12 = pnand %p958_p11, %p955_p10 }
  0x3b   :  { %963 = shalt.err (!%p960_p12)
}
  0x3c   :  { %s964_s27 = scalar_lea.vmem %s1103_s25, 1024  ;;  %p969_p0 = scmp.lt.s32.totalorder %s1103_s25, %s1103_s25 }
  0x3d   :  { %p965_p13 = scmp.ne.s32.totalorder %s1103_s25, %s964_s27  ;;  %p970_p1 = scmp.lt.s32.totalorder %s964_s27, %s964_s27 }
  0x3f   :  { %p971_p2 = por %p970_p1, %p969_p0 }
  0x41   :  { %p972_p3 = pnand %p971_p2, %p965_p13 }
  0x43   :  { %975 = shalt.err (!%p972_p3)
}
  0x44   :  { %77 = dma.hbm_to_vmem [thread:$0]  %s1239_s8, 1024, %s1103_s25, [#allocation11], %s1007_s23, %s1007_s23, %s1008_s24  }
  0x45   :  { %998 = dma.done.wait [#allocation5], 256  }
  0x46   :  { %999 = vsyncadd [#allocation5], 4294967040 }
  0x47   :  { %1000 = dma.done.wait [#allocation8], 2048  }
  0x48   :  { %1001 = vsyncadd [#allocation8], 4294965248 }
  0x49   :  { %1002 = dma.done.wait [#allocation11], 1024  }
  0x4a   :  { %1003 = vsyncadd [#allocation11], 4294966272  ;;  %v103_v0 = vlaneseq  ;;  %v1014_v1 = vmov 0.0   ;;  %v671_v4 = vld [vmem:[%s1232_s1] ss:$0 sm:$0xff]  ;;  %v1151_v6 = vld [vmem:[#allocation4 + $0x8] sm:$0xff] }
  0x4b   :  { %797 = vmatprep.subr.bf16.mxu1 %v1014_v1  ;;  %v1149_v5 = vld [vmem:[#allocation4] sm:$0xff]  ;;  %vm179_vm2 = vcmask 130048   ;;  %vm1015_vm3 = vmmov 0   ;;  %v870_v19 = vld [vmem:[#allocation9] sm:$0xff]   ;;  %v871_v20 = vld [vmem:[#allocation9 + $0x8] sm:$0xff]   ;;  %s378_s24 = sadd.f32 1.0, %s1231_s0 }
  0x4c   :  { %v1141_v2 = vshrl.u32 %v103_v0, 7  ;;  %v101_v7 = vpack.c.bf16 %v1151_v6, %v1149_v5  ;;  %813 = vmatprep.mubr.msk.bf16.mxu1 %vm1015_vm3, %v1014_v1  ;;  %v872_v21 = vld [vmem:[#allocation9 + $0x10] sm:$0xff]   ;;  %v873_v22 = vld [vmem:[#allocation9 + $0x18] sm:$0xff]   ;;  %v736_v23 = vld [vmem:[#allocation7 + $0x8] sm:$0xff]   ;;  %s1017_s3 = smov [#allocation12]  }
  0x4d   :  { %v705_v24 = vld [vmem:[#allocation7] sm:$0xff]   ;;  %v710_v25 = vunpack.c.l.bf16 %v736_v23  ;;  %v711_v27 = vunpack.c.h.bf16 %v736_v23  ;;  %v738_v34 = vld [vmem:[#allocation7 + $0x18] sm:$0xff]   ;;  %v737_v37 = vld [vmem:[#allocation7 + $0x10] sm:$0xff]   ;;  %s657_s28 = sshll.u32 %s1017_s3, 4  ;;  %s658_s28 = int_to_ptr.vmem [resolvable:$true] %s657_s28 }
  0x4e   :  { %v1144_v3 = vadd.s32 8, %v1141_v2  ;;  %vm111_vm0 = vcmp.eq.s32.totalorder %v1141_v2, %v671_v4  ;;  %779 = vmatprep.subr.bf16.mxu0 %v101_v7  ;;  %v706_v26 = vunpack.c.l.bf16 %v705_v24  ;;  %v707_v29 = vunpack.c.h.bf16 %v705_v24  ;;  %v740_v54 = vld [vmem:[#allocation7 + $0x28] sm:$0xff]   ;;  %v739_v57 = vld [vmem:[#allocation7 + $0x20] sm:$0xff]   ;;  %p981_p5 = scmp.lt.s32.totalorder %s658_s28, %s658_s28 }
  0x4f   :  { %v672_v8 = vsel %vm111_vm0, 1.0, %v1014_v1  ;;  %780 = vmatpush3.bf16.msra.mxu0 %v101_v7  ;;  %v718_v41 = vunpack.c.l.bf16 %v738_v34  ;;  %v714_v44 = vunpack.c.l.bf16 %v737_v37  ;;  %v719_v46 = vunpack.c.h.bf16 %v738_v34 }
  0x50   :  { %vm112_vm1 = vcmp.eq.s32.totalorder %v1144_v3, %v671_v4  ;;  %817 = vmatprep.subr.bf16.mxu0 %v1014_v1  ;;  %v715_v49 = vunpack.c.h.bf16 %v737_v37  ;;  %v726_v61 = vunpack.c.l.bf16 %v740_v54  ;;  %v722_v0 = vunpack.c.l.bf16 %v739_v57 }
  0x51   :  { %v673_v9 = vsel %vm112_vm1, 1.0, %v1014_v1  ;;  %v727_v7 = vunpack.c.h.bf16 %v740_v54 }
  0x52   :  { %v117_v10 = vpack.c.bf16 %v673_v9, %v672_v8 }
  0x54   :  { %163 = vxpose.xlu0.c.b16.start.end [1/1] (short) %v117_v10, 128  ;;  %v723_v10 = vunpack.c.h.bf16 %v739_v57 }
  0xba   :  { %v171_v11 = vpop.trf.xlu0 }
  0xbb   :  { %781 = vmatprep.mubr.msk.bf16.mxu0 %vm179_vm2, %v171_v11 }
  0xbe   :  { %v172_v12 = vpop.trf.xlu0 }
  0xbf   :  { %782 = vmatmul.mubr.msk.bf16.vlgmr.msra.gmra.mrb[0].mxu0 %vm179_vm2, %v172_v12 }
  0xc0   :  { %818 = vmatpush3.bf16.msra.mxu0 %v870_v19 }
  0xc1   :  { %819 = vmatprep.subr.bf16.mxu0 %v1014_v1 }
  0xc2   :  { %v173_v13 = vpop.trf.xlu0 }
  0xc3   :  { %785 = vmatprep.mubr.msk.bf16.mxu0 %vm179_vm2, %v173_v13 }
  0xc4   :  { %820 = vmatpush3.bf16.msra.mxu0 %v871_v20 }
  0xc5   :  { %821 = vmatprep.subr.bf16.mxu0 %v1014_v1 }
  0xc6   :  { %v174_v14 = vpop.trf.xlu0 }
  0xc7   :  { %786 = vmatmul.mubr.msk.bf16.gmra.mrb[4].mxu0 %vm179_vm2, %v174_v14 }
  0xc8   :  { %822 = vmatpush3.bf16.msra.mxu0 %v872_v21 }
  0xc9   :  { %823 = vmatprep.subr.bf16.mxu0 %v1014_v1 }
  0xca   :  { %v175_v15 = vpop.trf.xlu0 }
  0xcb   :  { %789 = vmatprep.mubr.msk.bf16.mxu0 %vm179_vm2, %v175_v15  ;;  %v742_v15 = vld [vmem:[#allocation7 + $0x38] sm:$0xff]  }
  0xcc   :  { %824 = vmatpush3.bf16.msra.mxu0 %v873_v22  ;;  %v734_v22 = vunpack.c.l.bf16 %v742_v15 }
  0xcd   :  { %825 = vmatprep.subr.bf16.mxu0 %v1014_v1 }
  0xce   :  { %v176_v16 = vpop.trf.xlu0 }
  0xcf   :  { %790 = vmatmul.mubr.msk.bf16.gmra.mrb[8].mxu0 %vm179_vm2, %v176_v16 }
  0xd2   :  { %v177_v17 = vpop.trf.xlu0 }
  0xd3   :  { %793 = vmatprep.mubr.msk.bf16.mxu0 %vm179_vm2, %v177_v17 }
  0xd6   :  { %v178_v18 = vpop.trf.xlu0 }
  0xd7   :  { %794 = vmatmul.mubr.msk.bf16.gmra.mrb[12].mxu0 %vm179_vm2, %v178_v18  ;;  %v741_v18 = vld [vmem:[#allocation7 + $0x30] sm:$0xff]  }
  0xd8   :  { %833 = vmatprep.mubr.msk.bf16.mxu0 %vm1015_vm3, %v1014_v1 }
 0x192   :  { %v783_v28 = vpop.f32.mrb[0].mxu0 }
 0x193   :  { %v247_v30 = vadd.f32 %v783_v28, %v710_v25  ;;  %v238_v31 = vpop.f32.mrb[1].mxu0  ;;  %v730_v25 = vunpack.c.l.bf16 %v741_v18 }
 0x194   :  { %v239_v32 = vadd.f32 %v706_v26, %v238_v31  ;;  %v784_v33 = vpop.f32.mrb[2].mxu0 }
 0x195   :  { %v250_v35 = vadd.f32 %v784_v33, %v711_v27  ;;  %v241_v36 = vpop.f32.mrb[3].mxu0  ;;  %v303_v39 = vmax.f32 %v247_v30, 0.0  ;;  %v735_v27 = vunpack.c.h.bf16 %v742_v15  ;;  %v731_v30 = vunpack.c.h.bf16 %v741_v18 }
 0x196   :  { %v242_v38 = vadd.f32 %v707_v29, %v241_v36  ;;  %v301_v42 = vmax.f32 %v239_v32, 0.0 }
 0x197   :  { %v304_v40 = vmax.f32 %v250_v35, 0.0 }
 0x198   :  { %v302_v43 = vmax.f32 %v242_v38, 0.0 }
 0x199   :  { %v320_v45 = vpack.c.bf16 %v304_v40, %v303_v39 }
 0x19a   :  { %v787_v47 = vpop.f32.mrb[4].mxu0  ;;  %v319_v48 = vpack.c.bf16 %v302_v43, %v301_v42 }
 0x19b   :  { %v263_v50 = vadd.f32 %v787_v47, %v718_v41  ;;  %v254_v51 = vpop.f32.mrb[5].mxu0  ;;  %v875_v47 = vld [vmem:[#allocation9 + $0x28] sm:$0xff]  }
 0x19c   :  { %v255_v52 = vadd.f32 %v714_v44, %v254_v51  ;;  %v788_v53 = vpop.f32.mrb[6].mxu0  ;;  %798 = vmatpush3.bf16.msra.mxu1 %v319_v48  ;;  %v674_v44 = vld [vmem:[%s1233_s2] ss:$0 sm:$0xff] }
 0x19d   :  { %v266_v55 = vadd.f32 %v788_v53, %v719_v46  ;;  %v257_v56 = vpop.f32.mrb[7].mxu0  ;;  %799 = vmatprep.subr.bf16.mxu1 %v1014_v1  ;;  %v307_v59 = vmax.f32 %v263_v50, 0.0  ;;  %vm123_vm4 = vcmp.eq.s32.totalorder %v1141_v2, %v674_v44  ;;  %vm124_vm5 = vcmp.eq.s32.totalorder %v1144_v3, %v674_v44  ;;  %v874_v46 = vld [vmem:[#allocation9 + $0x20] sm:$0xff]   ;;  %v876_v48 = vld [vmem:[#allocation9 + $0x30] sm:$0xff]   ;;  %v877_v3 = vld [vmem:[#allocation9 + $0x38] sm:$0xff]  }
 0x19e   :  { %v258_v58 = vadd.f32 %v715_v49, %v257_v56  ;;  %v305_v62 = vmax.f32 %v255_v52, 0.0  ;;  %vm685_vm6 = vmpackc.low %vm124_vm5, %vm123_vm4  ;;  %826 = vmatpush3.bf16.msra.mxu0 %v874_v46  ;;  %v381_v49 = vstv %s378_s24 }
 0x19f   :  { %v308_v60 = vmax.f32 %v266_v55, 0.0  ;;  %827 = vmatprep.subr.bf16.mxu0 %v1014_v1  ;;  %v382_v52 = vmul.f32 %v381_v49, %v1149_v5  ;;  %v383_v53 = vmul.f32 %v381_v49, %v1151_v6  ;;  %v881_v5 = vld [vmem:[#allocation10 + $0x18] sm:$0xff]   ;;  %v882_v6 = vld [vmem:[#allocation10 + $0x20] sm:$0xff]  }
 0x1a0   :  { %v306_v63 = vmax.f32 %v258_v58, 0.0  ;;  %800 = vmatpush3.bf16.msra.mxu1 %v320_v45  ;;  %v1016_v45 = vmov 1.0|1.0  }
 0x1a1   :  { %v322_v4 = vpack.c.bf16 %v308_v60, %v307_v59  ;;  %801 = vmatprep.subr.bf16.mxu1 %v1014_v1  ;;  %v878_v59 = vld [vmem:[#allocation10] sm:$0xff]   ;;  %v879_v60 = vld [vmem:[#allocation10 + $0x8] sm:$0xff]  }
 0x1a2   :  { %v321_v8 = vpack.c.bf16 %v306_v63, %v305_v62  ;;  %v791_v9 = vpop.f32.mrb[8].mxu0  ;;  %828 = vmatpush3.bf16.msra.mxu0 %v875_v47  ;;  %v883_v62 = vld [vmem:[#allocation10 + $0x28] sm:$0xff]   ;;  %v884_v63 = vld [vmem:[#allocation10 + $0x30] sm:$0xff]  }
 0x1a3   :  { %v279_v11 = vadd.f32 %v791_v9, %v726_v61  ;;  %v270_v12 = vpop.f32.mrb[9].mxu0  ;;  %829 = vmatprep.subr.bf16.mxu0 %v1014_v1  ;;  %v880_v61 = vld [vmem:[#allocation10 + $0x10] sm:$0xff]  }
 0x1a4   :  { %v271_v13 = vadd.f32 %v722_v0, %v270_v12  ;;  %v792_v14 = vpop.f32.mrb[10].mxu0  ;;  %802 = vmatpush3.bf16.msra.mxu1 %v321_v8  ;;  %v885_v0 = vld [vmem:[#allocation10 + $0x38] sm:$0xff]  }
 0x1a5   :  { %v282_v16 = vadd.f32 %v792_v14, %v727_v7  ;;  %v273_v17 = vpop.f32.mrb[11].mxu0  ;;  %803 = vmatprep.subr.bf16.mxu1 %v1014_v1  ;;  %v311_v20 = vmax.f32 %v279_v11, 0.0 }
 0x1a6   :  { %v274_v19 = vadd.f32 %v723_v10, %v273_v17  ;;  %v309_v23 = vmax.f32 %v271_v13, 0.0  ;;  %830 = vmatpush3.bf16.msra.mxu0 %v876_v48 }
 0x1a7   :  { %v312_v21 = vmax.f32 %v282_v16, 0.0  ;;  %831 = vmatprep.subr.bf16.mxu0 %v1014_v1 }
 0x1a8   :  { %v310_v24 = vmax.f32 %v274_v19, 0.0  ;;  %804 = vmatpush3.bf16.msra.mxu1 %v322_v4 }
 0x1a9   :  { %v324_v26 = vpack.c.bf16 %v312_v21, %v311_v20  ;;  %805 = vmatprep.subr.bf16.mxu1 %v1014_v1 }
 0x1aa   :  { %v323_v28 = vpack.c.bf16 %v310_v24, %v309_v23  ;;  %v795_v29 = vpop.f32.mrb[12].mxu0  ;;  %832 = vmatpush3.bf16.msra.mxu0 %v877_v3 }
 0x1ab   :  { %v295_v31 = vadd.f32 %v795_v29, %v734_v22  ;;  %v286_v32 = vpop.f32.mrb[13].mxu0 }
 0x1ac   :  { %v287_v33 = vadd.f32 %v730_v25, %v286_v32  ;;  %v796_v34 = vpop.f32.mrb[14].mxu0  ;;  %806 = vmatpush3.bf16.msra.mxu1 %v323_v28 }
 0x1ad   :  { %v298_v35 = vadd.f32 %v796_v34, %v735_v27  ;;  %v289_v36 = vpop.f32.mrb[15].mxu0  ;;  %807 = vmatprep.subr.bf16.mxu1 %v1014_v1  ;;  %v315_v38 = vmax.f32 %v295_v31, 0.0  ;;  %v522_v31 = vsub.s32 0, %v1141_v2  ;;  %v516_v34 = vld [vmem:[%s1238_s7] sm:$0x1]  ;;  %s976_s7 = scalar_lea.vmem %s658_s28, 256 }
 0x1ae   :  { %v290_v37 = vadd.f32 %v731_v30, %v289_v36  ;;  %v313_v40 = vmax.f32 %v287_v33, 0.0  ;;  %v512_v30 = vld [vmem:[%s1237_s6] sm:$0x1]  ;;  %p977_p4 = scmp.ne.s32.totalorder %s658_s28, %s976_s7  ;;  %p982_p6 = scmp.lt.s32.totalorder %s976_s7, %s976_s7 }
 0x1af   :  { %v316_v39 = vmax.f32 %v298_v35, 0.0  ;;  %v695_v2 = vld [vmem:[%s1240_s9] ss:$0 sm:$0xff] }
 0x1b0   :  { %v314_v41 = vmax.f32 %v290_v37, 0.0  ;;  %808 = vmatpush3.bf16.msra.mxu1 %v324_v26  ;;  %p983_p7 = por %p982_p6, %p981_p5 }
 0x1b1   :  { %v326_v42 = vpack.c.bf16 %v316_v39, %v315_v38  ;;  %809 = vmatprep.subr.bf16.mxu1 %v1014_v1 }
 0x1b2   :  { %v325_v43 = vpack.c.bf16 %v314_v41, %v313_v40  ;;  %p984_p8 = pnand %p983_p7, %p977_p4 }
 0x1b4   :  { %810 = vmatpush3.bf16.msra.mxu1 %v325_v43 }
 0x1b5   :  { %811 = vmatprep.subr.bf16.mxu1 %v1014_v1 }
 0x1b8   :  { %812 = vmatpush3.bf16.msra.mxu1 %v326_v42 }
 0x1b9   :  { %837 = vmatprep.subr.bf16.mxu1 %v1014_v1 }
 0x1bb   :  { %814 = vmatmul.mubr.msk.bf16.vlgmr.msra.gmra.mrb[0].mxu1 %vm685_vm6, %v1016_v45 }
 0x1bc   :  { %853 = vmatprep.mubr.msk.bf16.mxu1 %vm1015_vm3, %v1014_v1  ;;  %838 = vmatpush3.bf16.msra.mxu1 %v878_v59 }
 0x1bd   :  { %839 = vmatprep.subr.bf16.mxu1 %v1014_v1 }
 0x1c0   :  { %840 = vmatpush3.bf16.msra.mxu1 %v879_v60 }
 0x1c1   :  { %841 = vmatprep.subr.bf16.mxu1 %v1014_v1 }
 0x1c4   :  { %842 = vmatpush3.bf16.msra.mxu1 %v880_v61 }
 0x1c5   :  { %843 = vmatprep.subr.bf16.mxu1 %v1014_v1 }
 0x1c8   :  { %844 = vmatpush3.bf16.msra.mxu1 %v881_v5 }
 0x1c9   :  { %845 = vmatprep.subr.bf16.mxu1 %v1014_v1 }
 0x1cc   :  { %846 = vmatpush3.bf16.msra.mxu1 %v882_v6 }
 0x1cd   :  { %847 = vmatprep.subr.bf16.mxu1 %v1014_v1 }
 0x1d0   :  { %848 = vmatpush3.bf16.msra.mxu1 %v883_v62 }
 0x1d1   :  { %849 = vmatprep.subr.bf16.mxu1 %v1014_v1 }
 0x1d4   :  { %850 = vmatpush3.bf16.msra.mxu1 %v884_v63 }
 0x1d5   :  { %851 = vmatprep.subr.bf16.mxu1 %v1014_v1 }
 0x1d8   :  { %852 = vmatpush3.bf16.msra.mxu1 %v885_v0 }
 0x28e   :  { %v361_v50 = vpop.f32.mrb[0].mxu1 }
 0x28f   :  { %v815_v51 = vpop.f32.mrb[1].mxu1  ;;  %v384_v56 = vadd.f32 %v382_v52, %v361_v50 }
 0x290   :  { %v364_v54 = vpop.f32.mrb[2].mxu1 }
 0x291   :  { %v816_v55 = vpop.f32.mrb[3].mxu1  ;;  %v385_v57 = vadd.f32 %v383_v53, %v364_v54 }
 0x293   :  { %v386_v58 = vpack.c.bf16 %v385_v57, %v384_v56 }
 0x295   :  { %834 = vmatmul.mubr.bf16.vlgmr.msra.gmra.mrb[16].mxu0 %v386_v58 }
 0x368   :  { %v485_v4 = vpop.f32.mrb[16].mxu0 }
 0x369   :  { %v835_v7 = vpop.f32.mrb[17].mxu0 }
 0x36a   :  { %v488_v8 = vpop.f32.mrb[18].mxu0 }
 0x36b   :  { %v492_v9 = vadd.f32 %v488_v8, %v485_v4  ;;  %v836_v10 = vpop.f32.mrb[19].mxu0 }
 0x36d   :  { %v493_v11 = vrot.slane %v492_v9, 4 }
 0x36f   :  { %v494_v12 = vadd.f32 %v493_v11, %v492_v9 }
 0x371   :  { %v495_v13 = vrot.slane %v494_v12, 2 }
 0x373   :  { %v496_v14 = vadd.f32 %v495_v13, %v494_v12 }
 0x375   :  { %v497_v15 = vrot.slane %v496_v14, 1 }
 0x377   :  { %v498_v16 = vadd.f32 %v497_v15, %v496_v14 }
 0x379   :  { %v499_v17 = vmul.f32 0.0625, %v498_v16 }
 0x37b   :  { %v500_v18 = vsub.f32 %v485_v4, %v499_v17  ;;  %v501_v19 = vsub.f32 %v488_v8, %v499_v17 }
 0x37d   :  { %v502_v20 = vmul.f32 %v500_v18, %v500_v18  ;;  %v503_v21 = vmul.f32 %v501_v19, %v501_v19 }
 0x37f   :  { %v504_v22 = vadd.f32 %v503_v21, %v502_v20 }
 0x381   :  { %v505_v1 = vrot.slane %v504_v22, 4 }
 0x383   :  { %v506_v23 = vadd.f32 %v505_v1, %v504_v22 }
 0x385   :  { %v507_v24 = vrot.slane %v506_v23, 2 }
 0x387   :  { %v508_v25 = vadd.f32 %v507_v24, %v506_v23 }
 0x389   :  { %v509_v26 = vrot.slane %v508_v25, 1 }
 0x38b   :  { %v510_v27 = vadd.f32 %v509_v26, %v508_v25 }
 0x38d   :  { %v511_v28 = vmul.f32 0.0625, %v510_v27 }
 0x38f   :  { %v513_v29 = vadd.f32 1e-05, %v511_v28 }
 0x391   :  { %886 = vrsqrt.f32 %v513_v29 }
 0x39b   :  { %v887_v32 = vpop.eup %886 }
 0x39c   :  { %v515_v33 = vmul.f32 %v887_v32, %v512_v30 }
 0x39e   :  { %v517_v35 = vmul.f32 %v515_v33, %v499_v17  ;;  %v523_v36 = vrot.slane %v515_v33, %v522_v31 }
 0x3a0   :  { %v518_v37 = vsub.f32 %v516_v34, %v517_v35  ;;  %v525_v38 = vmul.f32 %v523_v36, %v485_v4  ;;  %v526_v39 = vmul.f32 %v523_v36, %v488_v8 }
 0x3a2   :  { %v531_v40 = vrot.slane %v518_v37, %v522_v31 }
 0x3a4   :  { %v533_v41 = vadd.f32 %v531_v40, %v525_v38  ;;  %v534_v42 = vadd.f32 %v531_v40, %v526_v39 }
 0x3a6   :  { %v536_v43 = vmax.f32 %v534_v42, 0.0  ;;  %v535_v44 = vmax.f32 %v533_v41, 0.0 }
 0x3a8   :  { %v537_v45 = vpack.c.bf16 %v536_v43, %v535_v44 }
 0x3aa   :  { %854 = vmatmul.mubr.bf16.vlgmr.msra.gmra.mrb[4].mxu1 %v537_v45 }
 0x47d   :  { %v643_v46 = vpop.f32.mrb[4].mxu1 }
 0x47e   :  { %v644_v47 = vadd.f32 %v695_v2, %v643_v46  ;;  %v855_v48 = vpop.f32.mrb[5].mxu1 }
 0x47f   :  { %v646_v3 = vpop.f32.mrb[6].mxu1 }
 0x480   :  { %650 = vst [vmem:[#allocation12] sm:$0xff] %v644_v47  ;;  %v647_v49 = vadd.f32 %v695_v2, %v646_v3  ;;  %v856_v50 = vpop.f32.mrb[7].mxu1 }
 0x482   :  { %651 = vst [vmem:[#allocation12 + $0x8] sm:$0xff] %v647_v49 }
 0x483   :  { %987 = shalt.err (!%p984_p8)
}
 0x484   :  { %s988_s16 = scalar_lea.hbm %s1241_s10, 256 }
 0x485   :  { %p989_p9 = scmp.ne.s32.totalorder %s1241_s10, %s988_s16  ;;  %p992_p10 = scmp.lt.u32.totalorder %s988_s16, %s1241_s10 }
 0x487   :  { %p994_p11 = pnand %p992_p10, %p989_p9 }
 0x489   :  { %997 = shalt.err (!%p994_p11)
}
 0x48a   :  { %663 = dma.vmem_to_hbm [thread:$0]  %s658_s28, 256, %s1241_s10, [#allocation6], %s1010_s4, %s1010_s4, %s1011_s14  }
 0x48b   :  { %1004 = dma.done.wait [#allocation6], 256  }
 0x48c   :  { %1005 = vsyncadd [#allocation6], 4294967040 }
 0x48d   :  { %667 = vsyncpa [#allocation5], 1 }
 0x48e   :  { %668 = vsyncpa [#allocation8], 1 }
 0x48f   :  { %669 = vsyncpa [#allocation11], 1 }
 0x490   :  { %670 = vsyncpa [#allocation6], 1 }

// kernel: tpu_custom_call.1
= control target key start
LH: loop header
LB: loop body
LE: loop exit
PB: predicated region body
PF: predicated region fallthrough
CT: control target
= control target key end

     0   :  { %16 = vsyncpa [#allocation5], 0  ;;  %s1231_s0 = inlined_call_operand.<no memory space> [shape: f32[1], index: 0, kind: input, shape index: {}]   ;;  %s1232_s1 = inlined_call_operand.vmem [shape: s32[1,128], index: 1, kind: input, shape index: {}]   ;;  %s1233_s2 = inlined_call_operand.vmem [shape: s32[1,128], index: 2, kind: input, shape index: {}]   ;;  %s1234_s3 = inlined_call_operand.hbm [shape: f32[16,128], index: 3, kind: input, shape index: {}]   ;;  %s1235_s4 = inlined_call_operand.hbm [shape: bf16[128,128], index: 4, kind: input, shape index: {}]   ;;  %s1236_s5 = inlined_call_operand.hbm [shape: bf16[128,128], index: 5, kind: input, shape index: {}]   ;;  %s1237_s6 = inlined_call_operand.vmem [shape: f32[1,128], index: 6, kind: input, shape index: {}]   ;;  %s1238_s7 = inlined_call_operand.vmem [shape: f32[1,128], index: 7, kind: input, shape index: {}]   ;;  %s1239_s8 = inlined_call_operand.hbm [shape: bf16[128,128], index: 8, kind: input, shape index: {}]   ;;  %s1240_s9 = inlined_call_operand.vmem [shape: f32[1,128], index: 9, kind: input, shape index: {}]   ;;  %s1241_s10 = inlined_call_operand.hbm [shape: f32[16,128], index: 10, kind: output, shape index: {}]  }
   0x1   :  { %17 = vsyncpa [#allocation8], 0 }
   0x2   :  { %18 = vsyncpa [#allocation11], 0 }
   0x3   :  { %19 = vsyncpa [#allocation6], 0  ;;  %s1006_s13 = smov [#allocation7]   ;;  %s888_s17 = scalar_lea.hbm %s1235_s4, 1024 }
   0x4   :  { %s43_s14 = sshll.u32 %s1006_s13, 4  ;;  %p889_p0 = scmp.ne.s32.totalorder %s1235_s4, %s888_s17  ;;  %s44_s14 = int_to_ptr.vmem [resolvable:$true] %s43_s14 }
   0x5   :  { %p892_p1 = scmp.lt.u32.totalorder %s888_s17, %s1235_s4 }
   0x7   :  { %p894_p2 = pnand %p892_p1, %p889_p0 }
   0x9   :  { %897 = shalt.err (!%p894_p2)
}
   0xa   :  { %s898_s22 = scalar_lea.vmem %s44_s14, 1024  ;;  %p903_p4 = scmp.lt.s32.totalorder %s44_s14, %s44_s14 }
   0xb   :  { %p899_p3 = scmp.ne.s32.totalorder %s44_s14, %s898_s22  ;;  %p904_p5 = scmp.lt.s32.totalorder %s898_s22, %s898_s22 }
   0xd   :  { %p905_p6 = por %p904_p5, %p903_p4 }
   0xf   :  { %p906_p7 = pnand %p905_p6, %p899_p3 }
  0x11   :  { %909 = shalt.err (!%p906_p7)
}
  0x12   :  { %s1007_s23 = smov 64   ;;  %s1008_s24 = smov 4  }
  0x13   :  { %49 = dma.hbm_to_vmem [thread:$0]  %s1235_s4, 1024, %s44_s14, [#allocation8], %s1007_s23, %s1007_s23, %s1008_s24  }
  0x14   :  { %s1009_s27 = smov [#allocation4]   ;;  %s910_s11 = scalar_lea.hbm %s1234_s3, 256 }
  0x15   :  { %s31_s28 = sshll.u32 %s1009_s27, 4  ;;  %p911_p8 = scmp.ne.s32.totalorder %s1234_s3, %s910_s11  ;;  %s32_s28 = int_to_ptr.vmem [resolvable:$true] %s31_s28 }
  0x16   :  { %p914_p9 = scmp.lt.u32.totalorder %s910_s11, %s1234_s3 }
  0x18   :  { %p916_p10 = pnand %p914_p9, %p911_p8 }
  0x1a   :  { %919 = shalt.err (!%p916_p10)
}
  0x1b   :  { %s920_s17 = scalar_lea.vmem %s32_s28, 256  ;;  %p925_p12 = scmp.lt.s32.totalorder %s32_s28, %s32_s28 }
  0x1c   :  { %p921_p11 = scmp.ne.s32.totalorder %s32_s28, %s920_s17  ;;  %p926_p13 = scmp.lt.s32.totalorder %s920_s17, %s920_s17 }
  0x1e   :  { %p927_p0 = por %p926_p13, %p925_p12 }
  0x20   :  { %p928_p1 = pnand %p927_p0, %p921_p11 }
  0x22   :  { %931 = shalt.err (!%p928_p1)
}
  0x23   :  { %s1010_s4 = smov 128   ;;  %s1011_s14 = smov 8  }
  0x24   :  { %37 = dma.hbm_to_vmem [thread:$0]  %s1234_s3, 256, %s32_s28, [#allocation5], %s1010_s4, %s1010_s4, %s1011_s14  }
  0x25   :  { %s1012_s20 = smov [#allocation9]   ;;  %s1013_s22 = smov [#allocation10]  }
  0x26   :  { %s55_s21 = sshll.u32 %s1012_s20, 4  ;;  %s71_s25 = sshll.u32 %s1013_s22, 4  ;;  %s56_s21 = int_to_ptr.vmem [resolvable:$true] %s55_s21  ;;  %s1103_s25 = int_to_ptr.vmem [resolvable:$true] %s71_s25 }
  0x27   :  { %s932_s29 = scalar_lea.hbm %s1236_s5, 1024 }
  0x28   :  { %p933_p2 = scmp.ne.s32.totalorder %s1236_s5, %s932_s29  ;;  %p936_p3 = scmp.lt.u32.totalorder %s932_s29, %s1236_s5 }
  0x2a   :  { %p938_p4 = pnand %p936_p3, %p933_p2 }
  0x2c   :  { %941 = shalt.err (!%p938_p4)
}
  0x2d   :  { %s942_s3 = scalar_lea.vmem %s56_s21, 1024  ;;  %p947_p6 = scmp.lt.s32.totalorder %s56_s21, %s56_s21 }
  0x2e   :  { %p943_p5 = scmp.ne.s32.totalorder %s56_s21, %s942_s3  ;;  %p948_p7 = scmp.lt.s32.totalorder %s942_s3, %s942_s3 }
  0x30   :  { %p949_p8 = por %p948_p7, %p947_p6 }
  0x32   :  { %p950_p9 = pnand %p949_p8, %p943_p5 }
  0x34   :  { %953 = shalt.err (!%p950_p9)
}
  0x35   :  { %61 = dma.hbm_to_vmem [thread:$0]  %s1236_s5, 1024, %s56_s21, [#allocation8], %s1007_s23, %s1007_s23, %s1008_s24  }
  0x36   :  { %s954_s18 = scalar_lea.hbm %s1239_s8, 1024 }
  0x37   :  { %p955_p10 = scmp.ne.s32.totalorder %s1239_s8, %s954_s18  ;;  %p958_p11 = scmp.lt.u32.totalorder %s954_s18, %s1239_s8 }
  0x39   :  { %p960_p12 = pnand %p958_p11, %p955_p10 }
  0x3b   :  { %963 = shalt.err (!%p960_p12)
}
  0x3c   :  { %s964_s27 = scalar_lea.vmem %s1103_s25, 1024  ;;  %p969_p0 = scmp.lt.s32.totalorder %s1103_s25, %s1103_s25 }
  0x3d   :  { %p965_p13 = scmp.ne.s32.totalorder %s1103_s25, %s964_s27  ;;  %p970_p1 = scmp.lt.s32.totalorder %s964_s27, %s964_s27 }
  0x3f   :  { %p971_p2 = por %p970_p1, %p969_p0 }
  0x41   :  { %p972_p3 = pnand %p971_p2, %p965_p13 }
  0x43   :  { %975 = shalt.err (!%p972_p3)
}
  0x44   :  { %77 = dma.hbm_to_vmem [thread:$0]  %s1239_s8, 1024, %s1103_s25, [#allocation11], %s1007_s23, %s1007_s23, %s1008_s24  }
  0x45   :  { %998 = dma.done.wait [#allocation5], 256  }
  0x46   :  { %999 = vsyncadd [#allocation5], 4294967040 }
  0x47   :  { %1000 = dma.done.wait [#allocation8], 2048  }
  0x48   :  { %1001 = vsyncadd [#allocation8], 4294965248 }
  0x49   :  { %1002 = dma.done.wait [#allocation11], 1024  }
  0x4a   :  { %1003 = vsyncadd [#allocation11], 4294966272  ;;  %v103_v0 = vlaneseq  ;;  %v1014_v1 = vmov 0.0   ;;  %v671_v4 = vld [vmem:[%s1232_s1] ss:$0 sm:$0xff]  ;;  %v1151_v6 = vld [vmem:[#allocation4 + $0x8] sm:$0xff] }
  0x4b   :  { %797 = vmatprep.subr.bf16.mxu1 %v1014_v1  ;;  %v1149_v5 = vld [vmem:[#allocation4] sm:$0xff]  ;;  %vm179_vm2 = vcmask 130048   ;;  %vm1015_vm3 = vmmov 0   ;;  %v870_v19 = vld [vmem:[#allocation9] sm:$0xff]   ;;  %v871_v20 = vld [vmem:[#allocation9 + $0x8] sm:$0xff]   ;;  %s378_s24 = sadd.f32 1.0, %s1231_s0 }
  0x4c   :  { %v1141_v2 = vshrl.u32 %v103_v0, 7  ;;  %v101_v7 = vpack.c.bf16 %v1151_v6, %v1149_v5  ;;  %813 = vmatprep.mubr.msk.bf16.mxu1 %vm1015_vm3, %v1014_v1  ;;  %v872_v21 = vld [vmem:[#allocation9 + $0x10] sm:$0xff]   ;;  %v873_v22 = vld [vmem:[#allocation9 + $0x18] sm:$0xff]   ;;  %v736_v23 = vld [vmem:[#allocation7 + $0x8] sm:$0xff]   ;;  %s1017_s3 = smov [#allocation12]  }
  0x4d   :  { %v705_v24 = vld [vmem:[#allocation7] sm:$0xff]   ;;  %v710_v25 = vunpack.c.l.bf16 %v736_v23  ;;  %v711_v27 = vunpack.c.h.bf16 %v736_v23  ;;  %v738_v34 = vld [vmem:[#allocation7 + $0x18] sm:$0xff]   ;;  %v737_v37 = vld [vmem:[#allocation7 + $0x10] sm:$0xff]   ;;  %s657_s28 = sshll.u32 %s1017_s3, 4  ;;  %s658_s28 = int_to_ptr.vmem [resolvable:$true] %s657_s28 }
  0x4e   :  { %v1144_v3 = vadd.s32 8, %v1141_v2  ;;  %vm111_vm0 = vcmp.eq.s32.totalorder %v1141_v2, %v671_v4  ;;  %779 = vmatprep.subr.bf16.mxu0 %v101_v7  ;;  %v706_v26 = vunpack.c.l.bf16 %v705_v24  ;;  %v707_v29 = vunpack.c.h.bf16 %v705_v24  ;;  %v740_v54 = vld [vmem:[#allocation7 + $0x28] sm:$0xff]   ;;  %v739_v57 = vld [vmem:[#allocation7 + $0x20] sm:$0xff]   ;;  %p981_p5 = scmp.lt.s32.totalorder %s658_s28, %s658_s28 }
  0x4f   :  { %v672_v8 = vsel %vm111_vm0, 1.0, %v1014_v1  ;;  %780 = vmatpush3.bf16.msra.mxu0 %v101_v7  ;;  %v718_v41 = vunpack.c.l.bf16 %v738_v34  ;;  %v714_v44 = vunpack.c.l.bf16 %v737_v37  ;;  %v719_v46 = vunpack.c.h.bf16 %v738_v34 }
  0x50   :  { %vm112_vm1 = vcmp.eq.s32.totalorder %v1144_v3, %v671_v4  ;;  %817 = vmatprep.subr.bf16.mxu0 %v1014_v1  ;;  %v715_v49 = vunpack.c.h.bf16 %v737_v37  ;;  %v726_v61 = vunpack.c.l.bf16 %v740_v54  ;;  %v722_v0 = vunpack.c.l.bf16 %v739_v57 }
  0x51   :  { %v673_v9 = vsel %vm112_vm1, 1.0, %v1014_v1  ;;  %v727_v7 = vunpack.c.h.bf16 %v740_v54 }
  0x52   :  { %v117_v10 = vpack.c.bf16 %v673_v9, %v672_v8 }
  0x54   :  { %163 = vxpose.xlu0.c.b16.start.end [1/1] (short) %v117_v10, 128  ;;  %v723_v10 = vunpack.c.h.bf16 %v739_v57 }
  0xba   :  { %v171_v11 = vpop.trf.xlu0 }
  0xbb   :  { %781 = vmatprep.mubr.msk.bf16.mxu0 %vm179_vm2, %v171_v11 }
  0xbe   :  { %v172_v12 = vpop.trf.xlu0 }
  0xbf   :  { %782 = vmatmul.mubr.msk.bf16.vlgmr.msra.gmra.mrb[0].mxu0 %vm179_vm2, %v172_v12 }
  0xc0   :  { %818 = vmatpush3.bf16.msra.mxu0 %v870_v19 }
  0xc1   :  { %819 = vmatprep.subr.bf16.mxu0 %v1014_v1 }
  0xc2   :  { %v173_v13 = vpop.trf.xlu0 }
  0xc3   :  { %785 = vmatprep.mubr.msk.bf16.mxu0 %vm179_vm2, %v173_v13 }
  0xc4   :  { %820 = vmatpush3.bf16.msra.mxu0 %v871_v20 }
  0xc5   :  { %821 = vmatprep.subr.bf16.mxu0 %v1014_v1 }
  0xc6   :  { %v174_v14 = vpop.trf.xlu0 }
  0xc7   :  { %786 = vmatmul.mubr.msk.bf16.gmra.mrb[4].mxu0 %vm179_vm2, %v174_v14 }
  0xc8   :  { %822 = vmatpush3.bf16.msra.mxu0 %v872_v21 }
  0xc9   :  { %823 = vmatprep.subr.bf16.mxu0 %v1014_v1 }
  0xca   :  { %v175_v15 = vpop.trf.xlu0 }
  0xcb   :  { %789 = vmatprep.mubr.msk.bf16.mxu0 %vm179_vm2, %v175_v15  ;;  %v742_v15 = vld [vmem:[#allocation7 + $0x38] sm:$0xff]  }
  0xcc   :  { %824 = vmatpush3.bf16.msra.mxu0 %v873_v22  ;;  %v734_v22 = vunpack.c.l.bf16 %v742_v15 }
  0xcd   :  { %825 = vmatprep.subr.bf16.mxu0 %v1014_v1 }
  0xce   :  { %v176_v16 = vpop.trf.xlu0 }
  0xcf   :  { %790 = vmatmul.mubr.msk.bf16.gmra.mrb[8].mxu0 %vm179_vm2, %v176_v16 }
  0xd2   :  { %v177_v17 = vpop.trf.xlu0 }
  0xd3   :  { %793 = vmatprep.mubr.msk.bf16.mxu0 %vm179_vm2, %v177_v17 }
  0xd6   :  { %v178_v18 = vpop.trf.xlu0 }
  0xd7   :  { %794 = vmatmul.mubr.msk.bf16.gmra.mrb[12].mxu0 %vm179_vm2, %v178_v18  ;;  %v741_v18 = vld [vmem:[#allocation7 + $0x30] sm:$0xff]  }
  0xd8   :  { %833 = vmatprep.mubr.msk.bf16.mxu0 %vm1015_vm3, %v1014_v1 }
 0x192   :  { %v783_v28 = vpop.f32.mrb[0].mxu0 }
 0x193   :  { %v247_v30 = vadd.f32 %v783_v28, %v710_v25  ;;  %v238_v31 = vpop.f32.mrb[1].mxu0  ;;  %v730_v25 = vunpack.c.l.bf16 %v741_v18 }
 0x194   :  { %v239_v32 = vadd.f32 %v706_v26, %v238_v31  ;;  %v784_v33 = vpop.f32.mrb[2].mxu0 }
 0x195   :  { %v250_v35 = vadd.f32 %v784_v33, %v711_v27  ;;  %v241_v36 = vpop.f32.mrb[3].mxu0  ;;  %v303_v39 = vmax.f32 %v247_v30, 0.0  ;;  %v735_v27 = vunpack.c.h.bf16 %v742_v15  ;;  %v731_v30 = vunpack.c.h.bf16 %v741_v18 }
 0x196   :  { %v242_v38 = vadd.f32 %v707_v29, %v241_v36  ;;  %v301_v42 = vmax.f32 %v239_v32, 0.0 }
 0x197   :  { %v304_v40 = vmax.f32 %v250_v35, 0.0 }
 0x198   :  { %v302_v43 = vmax.f32 %v242_v38, 0.0 }
 0x199   :  { %v320_v45 = vpack.c.bf16 %v304_v40, %v303_v39 }
 0x19a   :  { %v787_v47 = vpop.f32.mrb[4].mxu0  ;;  %v319_v48 = vpack.c.bf16 %v302_v43, %v301_v42 }
 0x19b   :  { %v263_v50 = vadd.f32 %v787_v47, %v718_v41  ;;  %v254_v51 = vpop.f32.mrb[5].mxu0  ;;  %v875_v47 = vld [vmem:[#allocation9 + $0x28] sm:$0xff]  }
 0x19c   :  { %v255_v52 = vadd.f32 %v714_v44, %v254_v51  ;;  %v788_v53 = vpop.f32.mrb[6].mxu0  ;;  %798 = vmatpush3.bf16.msra.mxu1 %v319_v48  ;;  %v674_v44 = vld [vmem:[%s1233_s2] ss:$0 sm:$0xff] }
 0x19d   :  { %v266_v55 = vadd.f32 %v788_v53, %v719_v46  ;;  %v257_v56 = vpop.f32.mrb[7].mxu0  ;;  %799 = vmatprep.subr.bf16.mxu1 %v1014_v1  ;;  %v307_v59 = vmax.f32 %v263_v50, 0.0  ;;  %vm123_vm4 = vcmp.eq.s32.totalorder %v1141_v2, %v674_v44  ;;  %vm124_vm5 = vcmp.eq.s32.totalorder %v1144_v3, %v674_v44  ;;  %v874_v46 = vld [vmem:[#allocation9 + $0x20] sm:$0xff]   ;;  %v876_v48 = vld [vmem:[#allocation9 + $0x30] sm:$0xff]   ;;  %v877_v3 = vld [vmem:[#allocation9 + $0x38] sm:$0xff]  }
 0x19e   :  { %v258_v58 = vadd.f32 %v715_v49, %v257_v56  ;;  %v305_v62 = vmax.f32 %v255_v52, 0.0  ;;  %vm685_vm6 = vmpackc.low %vm124_vm5, %vm123_vm4  ;;  %826 = vmatpush3.bf16.msra.mxu0 %v874_v46  ;;  %v381_v49 = vstv %s378_s24 }
 0x19f   :  { %v308_v60 = vmax.f32 %v266_v55, 0.0  ;;  %827 = vmatprep.subr.bf16.mxu0 %v1014_v1  ;;  %v382_v52 = vmul.f32 %v381_v49, %v1149_v5  ;;  %v383_v53 = vmul.f32 %v381_v49, %v1151_v6  ;;  %v881_v5 = vld [vmem:[#allocation10 + $0x18] sm:$0xff]   ;;  %v882_v6 = vld [vmem:[#allocation10 + $0x20] sm:$0xff]  }
 0x1a0   :  { %v306_v63 = vmax.f32 %v258_v58, 0.0  ;;  %800 = vmatpush3.bf16.msra.mxu1 %v320_v45  ;;  %v1016_v45 = vmov 1.0|1.0  }
 0x1a1   :  { %v322_v4 = vpack.c.bf16 %v308_v60, %v307_v59  ;;  %801 = vmatprep.subr.bf16.mxu1 %v1014_v1  ;;  %v878_v59 = vld [vmem:[#allocation10] sm:$0xff]   ;;  %v879_v60 = vld [vmem:[#allocation10 + $0x8] sm:$0xff]  }
 0x1a2   :  { %v321_v8 = vpack.c.bf16 %v306_v63, %v305_v62  ;;  %v791_v9 = vpop.f32.mrb[8].mxu0  ;;  %828 = vmatpush3.bf16.msra.mxu0 %v875_v47  ;;  %v883_v62 = vld [vmem:[#allocation10 + $0x28] sm:$0xff]   ;;  %v884_v63 = vld [vmem:[#allocation10 + $0x30] sm:$0xff]  }
 0x1a3   :  { %v279_v11 = vadd.f32 %v791_v9, %v726_v61  ;;  %v270_v12 = vpop.f32.mrb[9].mxu0  ;;  %829 = vmatprep.subr.bf16.mxu0 %v1014_v1  ;;  %v880_v61 = vld [vmem:[#allocation10 + $0x10] sm:$0xff]  }
 0x1a4   :  { %v271_v13 = vadd.f32 %v722_v0, %v270_v12  ;;  %v792_v14 = vpop.f32.mrb[10].mxu0  ;;  %802 = vmatpush3.bf16.msra.mxu1 %v321_v8  ;;  %v885_v0 = vld [vmem:[#allocation10 + $0x38] sm:$0xff]  }
 0x1a5   :  { %v282_v16 = vadd.f32 %v792_v14, %v727_v7  ;;  %v273_v17 = vpop.f32.mrb[11].mxu0  ;;  %803 = vmatprep.subr.bf16.mxu1 %v1014_v1  ;;  %v311_v20 = vmax.f32 %v279_v11, 0.0 }
 0x1a6   :  { %v274_v19 = vadd.f32 %v723_v10, %v273_v17  ;;  %v309_v23 = vmax.f32 %v271_v13, 0.0  ;;  %830 = vmatpush3.bf16.msra.mxu0 %v876_v48 }
 0x1a7   :  { %v312_v21 = vmax.f32 %v282_v16, 0.0  ;;  %831 = vmatprep.subr.bf16.mxu0 %v1014_v1 }
 0x1a8   :  { %v310_v24 = vmax.f32 %v274_v19, 0.0  ;;  %804 = vmatpush3.bf16.msra.mxu1 %v322_v4 }
 0x1a9   :  { %v324_v26 = vpack.c.bf16 %v312_v21, %v311_v20  ;;  %805 = vmatprep.subr.bf16.mxu1 %v1014_v1 }
 0x1aa   :  { %v323_v28 = vpack.c.bf16 %v310_v24, %v309_v23  ;;  %v795_v29 = vpop.f32.mrb[12].mxu0  ;;  %832 = vmatpush3.bf16.msra.mxu0 %v877_v3 }
 0x1ab   :  { %v295_v31 = vadd.f32 %v795_v29, %v734_v22  ;;  %v286_v32 = vpop.f32.mrb[13].mxu0 }
 0x1ac   :  { %v287_v33 = vadd.f32 %v730_v25, %v286_v32  ;;  %v796_v34 = vpop.f32.mrb[14].mxu0  ;;  %806 = vmatpush3.bf16.msra.mxu1 %v323_v28 }
 0x1ad   :  { %v298_v35 = vadd.f32 %v796_v34, %v735_v27  ;;  %v289_v36 = vpop.f32.mrb[15].mxu0  ;;  %807 = vmatprep.subr.bf16.mxu1 %v1014_v1  ;;  %v315_v38 = vmax.f32 %v295_v31, 0.0  ;;  %v522_v31 = vsub.s32 0, %v1141_v2  ;;  %v516_v34 = vld [vmem:[%s1238_s7] sm:$0x1]  ;;  %s976_s7 = scalar_lea.vmem %s658_s28, 256 }
 0x1ae   :  { %v290_v37 = vadd.f32 %v731_v30, %v289_v36  ;;  %v313_v40 = vmax.f32 %v287_v33, 0.0  ;;  %v512_v30 = vld [vmem:[%s1237_s6] sm:$0x1]  ;;  %p977_p4 = scmp.ne.s32.totalorder %s658_s28, %s976_s7  ;;  %p982_p6 = scmp.lt.s32.totalorder %s976_s7, %s976_s7 }
 0x1af   :  { %v316_v39 = vmax.f32 %v298_v35, 0.0  ;;  %v695_v2 = vld [vmem:[%s1240_s9] ss:$0 sm:$0xff] }
 0x1b0   :  { %v314_v41 = vmax.f32 %v290_v37, 0.0  ;;  %808 = vmatpush3.bf16.msra.mxu1 %v324_v26  ;;  %p983_p7 = por %p982_p6, %p981_p5 }
 0x1b1   :  { %v326_v42 = vpack.c.bf16 %v316_v39, %v315_v38  ;;  %809 = vmatprep.subr.bf16.mxu1 %v1014_v1 }
 0x1b2   :  { %v325_v43 = vpack.c.bf16 %v314_v41, %v313_v40  ;;  %p984_p8 = pnand %p983_p7, %p977_p4 }
 0x1b4   :  { %810 = vmatpush3.bf16.msra.mxu1 %v325_v43 }
 0x1b5   :  { %811 = vmatprep.subr.bf16.mxu1 %v1014_v1 }
 0x1b8   :  { %812 = vmatpush3.bf16.msra.mxu1 %v326_v42 }
 0x1b9   :  { %837 = vmatprep.subr.bf16.mxu1 %v1014_v1 }
 0x1bb   :  { %814 = vmatmul.mubr.msk.bf16.vlgmr.msra.gmra.mrb[0].mxu1 %vm685_vm6, %v1016_v45 }
 0x1bc   :  { %853 = vmatprep.mubr.msk.bf16.mxu1 %vm1015_vm3, %v1014_v1  ;;  %838 = vmatpush3.bf16.msra.mxu1 %v878_v59 }
 0x1bd   :  { %839 = vmatprep.subr.bf16.mxu1 %v1014_v1 }
 0x1c0   :  { %840 = vmatpush3.bf16.msra.mxu1 %v879_v60 }
 0x1c1   :  { %841 = vmatprep.subr.bf16.mxu1 %v1014_v1 }
 0x1c4   :  { %842 = vmatpush3.bf16.msra.mxu1 %v880_v61 }
 0x1c5   :  { %843 = vmatprep.subr.bf16.mxu1 %v1014_v1 }
 0x1c8   :  { %844 = vmatpush3.bf16.msra.mxu1 %v881_v5 }
 0x1c9   :  { %845 = vmatprep.subr.bf16.mxu1 %v1014_v1 }
 0x1cc   :  { %846 = vmatpush3.bf16.msra.mxu1 %v882_v6 }
 0x1cd   :  { %847 = vmatprep.subr.bf16.mxu1 %v1014_v1 }
 0x1d0   :  { %848 = vmatpush3.bf16.msra.mxu1 %v883_v62 }
 0x1d1   :  { %849 = vmatprep.subr.bf16.mxu1 %v1014_v1 }
 0x1d4   :  { %850 = vmatpush3.bf16.msra.mxu1 %v884_v63 }
 0x1d5   :  { %851 = vmatprep.subr.bf16.mxu1 %v1014_v1 }
 0x1d8   :  { %852 = vmatpush3.bf16.msra.mxu1 %v885_v0 }
 0x28e   :  { %v361_v50 = vpop.f32.mrb[0].mxu1 }
 0x28f   :  { %v815_v51 = vpop.f32.mrb[1].mxu1  ;;  %v384_v56 = vadd.f32 %v382_v52, %v361_v50 }
 0x290   :  { %v364_v54 = vpop.f32.mrb[2].mxu1 }
 0x291   :  { %v816_v55 = vpop.f32.mrb[3].mxu1  ;;  %v385_v57 = vadd.f32 %v383_v53, %v364_v54 }
 0x293   :  { %v386_v58 = vpack.c.bf16 %v385_v57, %v384_v56 }
 0x295   :  { %834 = vmatmul.mubr.bf16.vlgmr.msra.gmra.mrb[16].mxu0 %v386_v58 }
 0x368   :  { %v485_v4 = vpop.f32.mrb[16].mxu0 }
 0x369   :  { %v835_v7 = vpop.f32.mrb[17].mxu0 }
 0x36a   :  { %v488_v8 = vpop.f32.mrb[18].mxu0 }
 0x36b   :  { %v492_v9 = vadd.f32 %v488_v8, %v485_v4  ;;  %v836_v10 = vpop.f32.mrb[19].mxu0 }
 0x36d   :  { %v493_v11 = vrot.slane %v492_v9, 4 }
 0x36f   :  { %v494_v12 = vadd.f32 %v493_v11, %v492_v9 }
 0x371   :  { %v495_v13 = vrot.slane %v494_v12, 2 }
 0x373   :  { %v496_v14 = vadd.f32 %v495_v13, %v494_v12 }
 0x375   :  { %v497_v15 = vrot.slane %v496_v14, 1 }
 0x377   :  { %v498_v16 = vadd.f32 %v497_v15, %v496_v14 }
 0x379   :  { %v499_v17 = vmul.f32 0.0625, %v498_v16 }
 0x37b   :  { %v500_v18 = vsub.f32 %v485_v4, %v499_v17  ;;  %v501_v19 = vsub.f32 %v488_v8, %v499_v17 }
 0x37d   :  { %v502_v20 = vmul.f32 %v500_v18, %v500_v18  ;;  %v503_v21 = vmul.f32 %v501_v19, %v501_v19 }
 0x37f   :  { %v504_v22 = vadd.f32 %v503_v21, %v502_v20 }
 0x381   :  { %v505_v1 = vrot.slane %v504_v22, 4 }
 0x383   :  { %v506_v23 = vadd.f32 %v505_v1, %v504_v22 }
 0x385   :  { %v507_v24 = vrot.slane %v506_v23, 2 }
 0x387   :  { %v508_v25 = vadd.f32 %v507_v24, %v506_v23 }
 0x389   :  { %v509_v26 = vrot.slane %v508_v25, 1 }
 0x38b   :  { %v510_v27 = vadd.f32 %v509_v26, %v508_v25 }
 0x38d   :  { %v511_v28 = vmul.f32 0.0625, %v510_v27 }
 0x38f   :  { %v513_v29 = vadd.f32 1e-05, %v511_v28 }
 0x391   :  { %886 = vrsqrt.f32 %v513_v29 }
 0x39b   :  { %v887_v32 = vpop.eup %886 }
 0x39c   :  { %v515_v33 = vmul.f32 %v887_v32, %v512_v30 }
 0x39e   :  { %v517_v35 = vmul.f32 %v515_v33, %v499_v17  ;;  %v523_v36 = vrot.slane %v515_v33, %v522_v31 }
 0x3a0   :  { %v518_v37 = vsub.f32 %v516_v34, %v517_v35  ;;  %v525_v38 = vmul.f32 %v523_v36, %v485_v4  ;;  %v526_v39 = vmul.f32 %v523_v36, %v488_v8 }
 0x3a2   :  { %v531_v40 = vrot.slane %v518_v37, %v522_v31 }
 0x3a4   :  { %v533_v41 = vadd.f32 %v531_v40, %v525_v38  ;;  %v534_v42 = vadd.f32 %v531_v40, %v526_v39 }
 0x3a6   :  { %v536_v43 = vmax.f32 %v534_v42, 0.0  ;;  %v535_v44 = vmax.f32 %v533_v41, 0.0 }
 0x3a8   :  { %v537_v45 = vpack.c.bf16 %v536_v43, %v535_v44 }
 0x3aa   :  { %854 = vmatmul.mubr.bf16.vlgmr.msra.gmra.mrb[4].mxu1 %v537_v45 }
 0x47d   :  { %v643_v46 = vpop.f32.mrb[4].mxu1 }
 0x47e   :  { %v644_v47 = vadd.f32 %v695_v2, %v643_v46  ;;  %v855_v48 = vpop.f32.mrb[5].mxu1 }
 0x47f   :  { %v646_v3 = vpop.f32.mrb[6].mxu1 }
 0x480   :  { %650 = vst [vmem:[#allocation12] sm:$0xff] %v644_v47  ;;  %v647_v49 = vadd.f32 %v695_v2, %v646_v3  ;;  %v856_v50 = vpop.f32.mrb[7].mxu1 }
 0x482   :  { %651 = vst [vmem:[#allocation12 + $0x8] sm:$0xff] %v647_v49 }
 0x483   :  { %987 = shalt.err (!%p984_p8)
}
 0x484   :  { %s988_s16 = scalar_lea.hbm %s1241_s10, 256 }
 0x485   :  { %p989_p9 = scmp.ne.s32.totalorder %s1241_s10, %s988_s16  ;;  %p992_p10 = scmp.lt.u32.totalorder %s988_s16, %s1241_s10 }
 0x487   :  { %p994_p11 = pnand %p992_p10, %p989_p9 }
 0x489   :  { %997 = shalt.err (!%p994_p11)
}
 0x48a   :  { %663 = dma.vmem_to_hbm [thread:$0]  %s658_s28, 256, %s1241_s10, [#allocation6], %s1010_s4, %s1010_s4, %s1011_s14  }
 0x48b   :  { %1004 = dma.done.wait [#allocation6], 256  }
 0x48c   :  { %1005 = vsyncadd [#allocation6], 4294967040 }
 0x48d   :  { %667 = vsyncpa [#allocation5], 1 }
 0x48e   :  { %668 = vsyncpa [#allocation8], 1 }
 0x48f   :  { %669 = vsyncpa [#allocation11], 1 }
 0x490   :  { %670 = vsyncpa [#allocation6], 1 }

</bundles_post_ra>
